<compile_context>
chip_gen: v7x
topology: tpu7x:2x2x1
jax: 0.10.0
libtpu: 0.0.40
codegen_flags: <defaults>
</compile_context>

<pallas_src>
import math
import functools

import jax
import jax.numpy as jnp
from jax import lax
from jax.experimental import pallas as pl
from jax.experimental.pallas import tpu as pltpu


# Chain lengths (the serial matmul chain IS the cost of this tiny kernel):
#  * N_QUINTIC Muon-style quintic NS steps grow the smallest singular value
#    (~delta/||C||_F ~ 1e-4 here, covered down to ~3e-6) into the
#    polynomial's attractor band [~0.65, ~1.21] at ~3.44x per step.
#  * N_CUBIC plain cubic NS polish steps then converge quadratically to
#    f32-level orthogonality.
# Total serial matmuls: 3*N_QUINTIC + 2*N_CUBIC = 38 (previously 80).
N_QUINTIC = 10
N_CUBIC = 4

# Muon quintic coefficients.
_QA, _QB, _QC = 3.4445, -4.7750, 2.0315


def _gram(X, precision=None):
    """X^T X without materializing X.T (transpose folded into the MXU feed)."""
    return lax.dot_general(
        X, X, (((0,), (0,)), ((), ())),
        precision=precision, preferred_element_type=jnp.float32)


def _closest_etf_polar_kernel(mu_ref, y_ref, s_ref, o_ref, *,
                              n_quintic, n_cubic, K):
    """P = polar(c2 * Y @ M + mu * S)  on Stiefel(d, K),  M = I - 11'/K."""
    Y = y_ref[...]          # (d, K) feature means
    S = s_ref[...]          # (d, K) prox anchor (Stiefel-ish)
    mu = mu_ref[0]          # SMEM scalar -> value changes never recompile

    c2 = 2.0 / math.sqrt(K - 1)

    # Y @ M with M = I - 11'/K  ==  subtract the class-axis (lane) mean:
    # one XLU lane-reduce + VPU subtract instead of an MXU matmul round-trip.
    A = c2 * (Y - jnp.mean(Y, axis=-1, keepdims=True))
    C = A + mu * S

    # X_0 = C / ||C||_F  =>  all singular values in (0, 1].
    inv_norm = lax.rsqrt(jnp.sum(C * C) + 1e-30)   # EUP rsqrt (free slot)
    X = C * inv_norm

    hi = lax.Precision.HIGHEST

    # ---- growth phase: quintic Newton-Schulz, bulk with bf16 operands ----
    # All elementwise scale/adds stay in f32 (v5e VPU has no bf16).
    for step in range(n_quintic):
        if step == 0:
            # First step in f32/HIGHEST: rounding injected while the sigmas
            # are at their smallest perturbs the final polar factor the most.
            G = _gram(X, precision=hi)                                   # (K,K)
            G2 = jnp.dot(G, G, precision=hi,
                         preferred_element_type=jnp.float32)
            H = _QB * G + _QC * G2
            X = _QA * X + jnp.dot(X, H, precision=hi,
                                  preferred_element_type=jnp.float32)
        else:
            Xb = X.astype(jnp.bfloat16)
            G = _gram(Xb)                                                # (K,K) f32
            Gb = G.astype(jnp.bfloat16)
            G2 = jnp.dot(Gb, Gb, preferred_element_type=jnp.float32)
            Hb = (_QB * G + _QC * G2).astype(jnp.bfloat16)
            X = _QA * X + jnp.dot(Xb, Hb, preferred_element_type=jnp.float32)

    # ---- polish phase: cubic Newton-Schulz in f32 / HIGHEST --------------
    for _ in range(n_cubic):
        G = _gram(X, precision=hi)
        X = 1.5 * X - 0.5 * jnp.dot(X, G, precision=hi,
                                    preferred_element_type=jnp.float32)

    o_ref[...] = X.astype(o_ref.dtype)


def _polar_prox_solve(Y, S, mu, *, n_quintic=N_QUINTIC, n_cubic=N_CUBIC):
    """One closest-ETF (prox-regularised) Stiefel solve = one polar factor."""
    d, K = Y.shape
    kernel = functools.partial(_closest_etf_polar_kernel,
                               n_quintic=int(n_quintic), n_cubic=int(n_cubic),
                               K=int(K))
    flops = (int(n_quintic) * (4 * d * K * K + 2 * K ** 3)
             + int(n_cubic) * 4 * d * K * K + 10 * d * K)
    # Gridless, whole-array-in-VMEM (operands are ~1 KiB): no tiling, no
    # pipelining, no vmem_limit override needed on any generation.
    return pl.pallas_call(
        kernel,
        out_shape=jax.ShapeDtypeStruct((d, K), jnp.float32),
        in_specs=[pl.BlockSpec(memory_space=pltpu.MemorySpace.SMEM),   # mu
                  pl.BlockSpec(memory_space=pltpu.MemorySpace.VMEM),   # Y
                  pl.BlockSpec(memory_space=pltpu.MemorySpace.VMEM)],  # S
        out_specs=pl.BlockSpec(memory_space=pltpu.MemorySpace.VMEM),
        cost_estimate=pl.CostEstimate(flops=flops, transcendentals=1,
                                      bytes_accessed=3 * d * K * 4 + 4),
    )(jnp.asarray([mu], dtype=jnp.float32),
      Y.astype(jnp.float32), S.astype(jnp.float32))


class ClosestETFGeometryLayer:
    """JAX/Pallas port of the PyTorch ClosestETFGeometryLayer (forward only).

    Note: the layer keeps self.Prox / self.P_init as Python state (same
    semantics as the torch module), so forward() is stateful and not meant
    to be jitted/vmapped as-is.
    """

    DELTA = 1e-3   # same proximal weight as the torch module

    def __init__(self, dimensions, num_classes):
        self.dimensions = dimensions
        self.K = num_classes
        self.M = (jnp.eye(self.K, dtype=jnp.float32)
                  - jnp.ones((self.K, self.K), jnp.float32) / self.K)
        self.Prox = None
        self.P_init = None
        # LKI is only consumed by the custom backward pass; built for parity.
        p = jnp.arange(self.K * self.K).reshape(self.K, self.K).T.ravel()
        Ikk = jnp.eye(self.K * self.K, dtype=jnp.float32)
        tril_r, tril_c = jnp.tril_indices(self.K)
        Lk = jnp.zeros((self.K * (self.K + 1) // 2, self.K * self.K),
                       jnp.float32)
        Lk = Lk.at[jnp.arange(tril_r.shape[0]),
                   tril_r * self.K + tril_c].set(1.0)
        self.LKI = Lk @ (Ikk[p, :] + Ikk)
        # TODO(synk): the implicit-function backward (ClosestETFGeometryFcn.backward,
        # Cholesky/blockwise solves with LKI) is not ported; forward pass only.

    def forward(self, feature_means):
        d, K = feature_means.shape
        Y = feature_means.astype(jnp.float32)
        if self.P_init is None:
            # Feasibility stage (torch: TrustRegions from eye(d,K), no prox).
            # The optimum of the unregularised cost is polar(Y@M) up to its
            # rank completion; the delta*eye(d,K) anchor only pins that
            # cost-free completion and perturbs P0 @ M by O(delta / sigma).
            # Same compiled kernel, different SMEM scalar -> no recompile.
            X0 = jnp.eye(d, K, dtype=jnp.float32)
            P0 = _polar_prox_solve(Y, X0, self.DELTA)
            self.P_init = P0
            self.Prox = P0
        # Prox-regularised stage (delta = 1e-3, as in the torch module).
        P = _polar_prox_solve(Y, self.Prox, self.DELTA)
        self.Prox = P
        self.P_init = P
        return P

    __call__ = forward


if __name__ == "__main__":
    d, K = 32, 8   # dimensions, num_classes (small demo shapes)
    key = jax.random.PRNGKey(0)
    feature_means = jax.random.normal(key, (d, K), dtype=jnp.float32)

    layer = ClosestETFGeometryLayer(d, K)
    P = layer(feature_means)
    P = jax.block_until_ready(P)

    # Sanity checks: P lies on Stiefel(d, K) and P @ M matches the unique
    # closest-ETF geometry (polar factor of Y @ M, projected by M).
    M = layer.M
    ortho_err = float(jnp.max(jnp.abs(P.T @ P - jnp.eye(K, dtype=jnp.float32))))
    U, _, Vt = jnp.linalg.svd(feature_means @ M, full_matrices=False)
    etf_err = float(jnp.max(jnp.abs(P @ M - (U @ Vt) @ M)))
    assert bool(jnp.all(jnp.isfinite(P)))
    assert ortho_err < 1e-2, ortho_err
    assert etf_err < 2e-2, etf_err
    print("KERNEL_OK")
</pallas_src>

<mosaic_0001>
module attributes {stable_mosaic.version = 11 : i64} {
  func.func @_closest_etf_polar_kernel(%arg0: memref<1xf32, #tpu.memory_space<smem>>, %arg1: memref<32x8xf32, #tpu.memory_space<vmem>>, %arg2: memref<32x8xf32, #tpu.memory_space<vmem>>, %arg3: memref<32x8xf32, #tpu.memory_space<vmem>>) attributes {dimension_semantics = [], scalar_prefetch = 0 : i64, scratch_operands = 0 : i64, tpu.core_type = #tpu.core_type<tc>} {
    %c0 = arith.constant 0 : index
    %c0_0 = arith.constant 0 : index
    %0 = vector.load %arg1[%c0, %c0_0] : memref<32x8xf32, #tpu.memory_space<vmem>>, vector<32x8xf32>
    %c0_1 = arith.constant 0 : index
    %c0_2 = arith.constant 0 : index
    %1 = vector.load %arg2[%c0_1, %c0_2] : memref<32x8xf32, #tpu.memory_space<vmem>>, vector<32x8xf32>
    %c0_3 = arith.constant 0 : index
    %2 = memref.load %arg0[%c0_3] : memref<1xf32, #tpu.memory_space<smem>>
    %cst = arith.constant dense<0.000000e+00> : vector<32xf32>
    %3 = vector.multi_reduction <add>, %0, %cst [1] : vector<32x8xf32> to vector<32xf32>
    %4 = vector.shape_cast %3 : vector<32xf32> to vector<32x1xf32>
    %cst_4 = arith.constant 8.000000e+00 : f32
    %5 = vector.broadcast %cst_4 : f32 to vector<32x1xf32>
    %6 = arith.divf %4, %5 : vector<32x1xf32>
    %7 = vector.broadcast %6 : vector<32x1xf32> to vector<32x8xf32>
    %8 = arith.subf %0, %7 : vector<32x8xf32>
    %cst_5 = arith.constant 0.755928933 : f32
    %9 = vector.broadcast %cst_5 : f32 to vector<32x8xf32>
    %10 = arith.mulf %9, %8 : vector<32x8xf32>
    %11 = vector.broadcast %2 : f32 to vector<32x8xf32>
    %12 = arith.mulf %11, %1 : vector<32x8xf32>
    %13 = arith.addf %10, %12 : vector<32x8xf32>
    %14 = arith.mulf %13, %13 : vector<32x8xf32>
    %15 = vector.shape_cast %14 : vector<32x8xf32> to vector<1x32x8xf32>
    %cst_6 = arith.constant dense<0.000000e+00> : vector<1xf32>
    %16 = vector.multi_reduction <add>, %15, %cst_6 [1, 2] : vector<1x32x8xf32> to vector<1xf32>
    %17 = vector.shape_cast %16 : vector<1xf32> to vector<1x1x1xf32>
    %18 = vector.extract %17[0, 0, 0] : f32 from vector<1x1x1xf32>
    %cst_7 = arith.constant 1.000000e-30 : f32
    %19 = arith.addf %18, %cst_7 : f32
    %20 = math.rsqrt %19 : f32
    %21 = vector.broadcast %20 : f32 to vector<32x8xf32>
    %22 = arith.mulf %13, %21 : vector<32x8xf32>
    %cst_8 = arith.constant dense<0.000000e+00> : vector<8x8xf32>
    %23 = tpu.matmul %22, %22, %cst_8 {dimension_numbers = #tpu.dot_dimension_numbers<[0], [0], [1], [1], [0, 1, 1, 1], [], []>, precision = #tpu.contract_precision<fp32>} : vector<32x8xf32>, vector<32x8xf32>, vector<8x8xf32> -> vector<8x8xf32>
    %cst_9 = arith.constant dense<0.000000e+00> : vector<8x8xf32>
    %24 = tpu.matmul %23, %23, %cst_9 {dimension_numbers = #tpu.dot_dimension_numbers<[1], [0], [0], [1], [0, 0, 1, 1], [], []>, precision = #tpu.contract_precision<fp32>} : vector<8x8xf32>, vector<8x8xf32>, vector<8x8xf32> -> vector<8x8xf32>
    %cst_10 = arith.constant -4.775000e+00 : f32
    %25 = vector.broadcast %cst_10 : f32 to vector<8x8xf32>
    %26 = arith.mulf %25, %23 : vector<8x8xf32>
    %cst_11 = arith.constant 2.031500e+00 : f32
    %27 = vector.broadcast %cst_11 : f32 to vector<8x8xf32>
    %28 = arith.mulf %27, %24 : vector<8x8xf32>
    %29 = arith.addf %26, %28 : vector<8x8xf32>
    %cst_12 = arith.constant 3.444500e+00 : f32
    %30 = vector.broadcast %cst_12 : f32 to vector<32x8xf32>
    %31 = arith.mulf %30, %22 : vector<32x8xf32>
    %cst_13 = arith.constant dense<0.000000e+00> : vector<32x8xf32>
    %32 = tpu.matmul %22, %29, %cst_13 {dimension_numbers = #tpu.dot_dimension_numbers<[1], [0], [0], [1], [0, 0, 1, 1], [], []>, precision = #tpu.contract_precision<fp32>} : vector<32x8xf32>, vector<8x8xf32>, vector<32x8xf32> -> vector<32x8xf32>
    %33 = arith.addf %31, %32 : vector<32x8xf32>
    %34 = arith.truncf %33 : vector<32x8xf32> to vector<32x8xbf16>
    %cst_14 = arith.constant dense<0.000000e+00> : vector<8x8xf32>
    %35 = tpu.matmul %34, %34, %cst_14 {dimension_numbers = #tpu.dot_dimension_numbers<[0], [0], [1], [1], [0, 1, 1, 1], [], []>} : vector<32x8xbf16>, vector<32x8xbf16>, vector<8x8xf32> -> vector<8x8xf32>
    %36 = arith.truncf %35 : vector<8x8xf32> to vector<8x8xbf16>
    %cst_15 = arith.constant dense<0.000000e+00> : vector<8x8xf32>
    %37 = tpu.matmul %36, %36, %cst_15 {dimension_numbers = #tpu.dot_dimension_numbers<[1], [0], [0], [1], [0, 0, 1, 1], [], []>} : vector<8x8xbf16>, vector<8x8xbf16>, vector<8x8xf32> -> vector<8x8xf32>
    %cst_16 = arith.constant -4.775000e+00 : f32
    %38 = vector.broadcast %cst_16 : f32 to vector<8x8xf32>
    %39 = arith.mulf %38, %35 : vector<8x8xf32>
    %cst_17 = arith.constant 2.031500e+00 : f32
    %40 = vector.broadcast %cst_17 : f32 to vector<8x8xf32>
    %41 = arith.mulf %40, %37 : vector<8x8xf32>
    %42 = arith.addf %39, %41 : vector<8x8xf32>
    %43 = arith.truncf %42 : vector<8x8xf32> to vector<8x8xbf16>
    %cst_18 = arith.constant 3.444500e+00 : f32
    %44 = vector.broadcast %cst_18 : f32 to vector<32x8xf32>
    %45 = arith.mulf %44, %33 : vector<32x8xf32>
    %cst_19 = arith.constant dense<0.000000e+00> : vector<32x8xf32>
    %46 = tpu.matmul %34, %43, %cst_19 {dimension_numbers = #tpu.dot_dimension_numbers<[1], [0], [0], [1], [0, 0, 1, 1], [], []>} : vector<32x8xbf16>, vector<8x8xbf16>, vector<32x8xf32> -> vector<32x8xf32>
    %47 = arith.addf %45, %46 : vector<32x8xf32>
    %48 = arith.truncf %47 : vector<32x8xf32> to vector<32x8xbf16>
    %cst_20 = arith.constant dense<0.000000e+00> : vector<8x8xf32>
    %49 = tpu.matmul %48, %48, %cst_20 {dimension_numbers = #tpu.dot_dimension_numbers<[0], [0], [1], [1], [0, 1, 1, 1], [], []>} : vector<32x8xbf16>, vector<32x8xbf16>, vector<8x8xf32> -> vector<8x8xf32>
    %50 = arith.truncf %49 : vector<8x8xf32> to vector<8x8xbf16>
    %cst_21 = arith.constant dense<0.000000e+00> : vector<8x8xf32>
    %51 = tpu.matmul %50, %50, %cst_21 {dimension_numbers = #tpu.dot_dimension_numbers<[1], [0], [0], [1], [0, 0, 1, 1], [], []>} : vector<8x8xbf16>, vector<8x8xbf16>, vector<8x8xf32> -> vector<8x8xf32>
    %cst_22 = arith.constant -4.775000e+00 : f32
    %52 = vector.broadcast %cst_22 : f32 to vector<8x8xf32>
    %53 = arith.mulf %52, %49 : vector<8x8xf32>
    %cst_23 = arith.constant 2.031500e+00 : f32
    %54 = vector.broadcast %cst_23 : f32 to vector<8x8xf32>
    %55 = arith.mulf %54, %51 : vector<8x8xf32>
    %56 = arith.addf %53, %55 : vector<8x8xf32>
    %57 = arith.truncf %56 : vector<8x8xf32> to vector<8x8xbf16>
    %cst_24 = arith.constant 3.444500e+00 : f32
    %58 = vector.broadcast %cst_24 : f32 to vector<32x8xf32>
    %59 = arith.mulf %58, %47 : vector<32x8xf32>
    %cst_25 = arith.constant dense<0.000000e+00> : vector<32x8xf32>
    %60 = tpu.matmul %48, %57, %cst_25 {dimension_numbers = #tpu.dot_dimension_numbers<[1], [0], [0], [1], [0, 0, 1, 1], [], []>} : vector<32x8xbf16>, vector<8x8xbf16>, vector<32x8xf32> -> vector<32x8xf32>
    %61 = arith.addf %59, %60 : vector<32x8xf32>
    %62 = arith.truncf %61 : vector<32x8xf32> to vector<32x8xbf16>
    %cst_26 = arith.constant dense<0.000000e+00> : vector<8x8xf32>
    %63 = tpu.matmul %62, %62, %cst_26 {dimension_numbers = #tpu.dot_dimension_numbers<[0], [0], [1], [1], [0, 1, 1, 1], [], []>} : vector<32x8xbf16>, vector<32x8xbf16>, vector<8x8xf32> -> vector<8x8xf32>
    %64 = arith.truncf %63 : vector<8x8xf32> to vector<8x8xbf16>
    %cst_27 = arith.constant dense<0.000000e+00> : vector<8x8xf32>
    %65 = tpu.matmul %64, %64, %cst_27 {dimension_numbers = #tpu.dot_dimension_numbers<[1], [0], [0], [1], [0, 0, 1, 1], [], []>} : vector<8x8xbf16>, vector<8x8xbf16>, vector<8x8xf32> -> vector<8x8xf32>
    %cst_28 = arith.constant -4.775000e+00 : f32
    %66 = vector.broadcast %cst_28 : f32 to vector<8x8xf32>
    %67 = arith.mulf %66, %63 : vector<8x8xf32>
    %cst_29 = arith.constant 2.031500e+00 : f32
    %68 = vector.broadcast %cst_29 : f32 to vector<8x8xf32>
    %69 = arith.mulf %68, %65 : vector<8x8xf32>
    %70 = arith.addf %67, %69 : vector<8x8xf32>
    %71 = arith.truncf %70 : vector<8x8xf32> to vector<8x8xbf16>
    %cst_30 = arith.constant 3.444500e+00 : f32
    %72 = vector.broadcast %cst_30 : f32 to vector<32x8xf32>
    %73 = arith.mulf %72, %61 : vector<32x8xf32>
    %cst_31 = arith.constant dense<0.000000e+00> : vector<32x8xf32>
    %74 = tpu.matmul %62, %71, %cst_31 {dimension_numbers = #tpu.dot_dimension_numbers<[1], [0], [0], [1], [0, 0, 1, 1], [], []>} : vector<32x8xbf16>, vector<8x8xbf16>, vector<32x8xf32> -> vector<32x8xf32>
    %75 = arith.addf %73, %74 : vector<32x8xf32>
    %76 = arith.truncf %75 : vector<32x8xf32> to vector<32x8xbf16>
    %cst_32 = arith.constant dense<0.000000e+00> : vector<8x8xf32>
    %77 = tpu.matmul %76, %76, %cst_32 {dimension_numbers = #tpu.dot_dimension_numbers<[0], [0], [1], [1], [0, 1, 1, 1], [], []>} : vector<32x8xbf16>, vector<32x8xbf16>, vector<8x8xf32> -> vector<8x8xf32>
    %78 = arith.truncf %77 : vector<8x8xf32> to vector<8x8xbf16>
    %cst_33 = arith.constant dense<0.000000e+00> : vector<8x8xf32>
    %79 = tpu.matmul %78, %78, %cst_33 {dimension_numbers = #tpu.dot_dimension_numbers<[1], [0], [0], [1], [0, 0, 1, 1], [], []>} : vector<8x8xbf16>, vector<8x8xbf16>, vector<8x8xf32> -> vector<8x8xf32>
    %cst_34 = arith.constant -4.775000e+00 : f32
    %80 = vector.broadcast %cst_34 : f32 to vector<8x8xf32>
    %81 = arith.mulf %80, %77 : vector<8x8xf32>
    %cst_35 = arith.constant 2.031500e+00 : f32
    %82 = vector.broadcast %cst_35 : f32 to vector<8x8xf32>
    %83 = arith.mulf %82, %79 : vector<8x8xf32>
    %84 = arith.addf %81, %83 : vector<8x8xf32>
    %85 = arith.truncf %84 : vector<8x8xf32> to vector<8x8xbf16>
    %cst_36 = arith.constant 3.444500e+00 : f32
    %86 = vector.broadcast %cst_36 : f32 to vector<32x8xf32>
    %87 = arith.mulf %86, %75 : vector<32x8xf32>
    %cst_37 = arith.constant dense<0.000000e+00> : vector<32x8xf32>
    %88 = tpu.matmul %76, %85, %cst_37 {dimension_numbers = #tpu.dot_dimension_numbers<[1], [0], [0], [1], [0, 0, 1, 1], [], []>} : vector<32x8xbf16>, vector<8x8xbf16>, vector<32x8xf32> -> vector<32x8xf32>
    %89 = arith.addf %87, %88 : vector<32x8xf32>
    %90 = arith.truncf %89 : vector<32x8xf32> to vector<32x8xbf16>
    %cst_38 = arith.constant dense<0.000000e+00> : vector<8x8xf32>
    %91 = tpu.matmul %90, %90, %cst_38 {dimension_numbers = #tpu.dot_dimension_numbers<[0], [0], [1], [1], [0, 1, 1, 1], [], []>} : vector<32x8xbf16>, vector<32x8xbf16>, vector<8x8xf32> -> vector<8x8xf32>
    %92 = arith.truncf %91 : vector<8x8xf32> to vector<8x8xbf16>
    %cst_39 = arith.constant dense<0.000000e+00> : vector<8x8xf32>
    %93 = tpu.matmul %92, %92, %cst_39 {dimension_numbers = #tpu.dot_dimension_numbers<[1], [0], [0], [1], [0, 0, 1, 1], [], []>} : vector<8x8xbf16>, vector<8x8xbf16>, vector<8x8xf32> -> vector<8x8xf32>
    %cst_40 = arith.constant -4.775000e+00 : f32
    %94 = vector.broadcast %cst_40 : f32 to vector<8x8xf32>
    %95 = arith.mulf %94, %91 : vector<8x8xf32>
    %cst_41 = arith.constant 2.031500e+00 : f32
    %96 = vector.broadcast %cst_41 : f32 to vector<8x8xf32>
    %97 = arith.mulf %96, %93 : vector<8x8xf32>
    %98 = arith.addf %95, %97 : vector<8x8xf32>
    %99 = arith.truncf %98 : vector<8x8xf32> to vector<8x8xbf16>
    %cst_42 = arith.constant 3.444500e+00 : f32
    %100 = vector.broadcast %cst_42 : f32 to vector<32x8xf32>
    %101 = arith.mulf %100, %89 : vector<32x8xf32>
    %cst_43 = arith.constant dense<0.000000e+00> : vector<32x8xf32>
    %102 = tpu.matmul %90, %99, %cst_43 {dimension_numbers = #tpu.dot_dimension_numbers<[1], [0], [0], [1], [0, 0, 1, 1], [], []>} : vector<32x8xbf16>, vector<8x8xbf16>, vector<32x8xf32> -> vector<32x8xf32>
    %103 = arith.addf %101, %102 : vector<32x8xf32>
    %104 = arith.truncf %103 : vector<32x8xf32> to vector<32x8xbf16>
    %cst_44 = arith.constant dense<0.000000e+00> : vector<8x8xf32>
    %105 = tpu.matmul %104, %104, %cst_44 {dimension_numbers = #tpu.dot_dimension_numbers<[0], [0], [1], [1], [0, 1, 1, 1], [], []>} : vector<32x8xbf16>, vector<32x8xbf16>, vector<8x8xf32> -> vector<8x8xf32>
    %106 = arith.truncf %105 : vector<8x8xf32> to vector<8x8xbf16>
    %cst_45 = arith.constant dense<0.000000e+00> : vector<8x8xf32>
    %107 = tpu.matmul %106, %106, %cst_45 {dimension_numbers = #tpu.dot_dimension_numbers<[1], [0], [0], [1], [0, 0, 1, 1], [], []>} : vector<8x8xbf16>, vector<8x8xbf16>, vector<8x8xf32> -> vector<8x8xf32>
    %cst_46 = arith.constant -4.775000e+00 : f32
    %108 = vector.broadcast %cst_46 : f32 to vector<8x8xf32>
    %109 = arith.mulf %108, %105 : vector<8x8xf32>
    %cst_47 = arith.constant 2.031500e+00 : f32
    %110 = vector.broadcast %cst_47 : f32 to vector<8x8xf32>
    %111 = arith.mulf %110, %107 : vector<8x8xf32>
    %112 = arith.addf %109, %111 : vector<8x8xf32>
    %113 = arith.truncf %112 : vector<8x8xf32> to vector<8x8xbf16>
    %cst_48 = arith.constant 3.444500e+00 : f32
    %114 = vector.broadcast %cst_48 : f32 to vector<32x8xf32>
    %115 = arith.mulf %114, %103 : vector<32x8xf32>
    %cst_49 = arith.constant dense<0.000000e+00> : vector<32x8xf32>
    %116 = tpu.matmul %104, %113, %cst_49 {dimension_numbers = #tpu.dot_dimension_numbers<[1], [0], [0], [1], [0, 0, 1, 1], [], []>} : vector<32x8xbf16>, vector<8x8xbf16>, vector<32x8xf32> -> vector<32x8xf32>
    %117 = arith.addf %115, %116 : vector<32x8xf32>
    %118 = arith.truncf %117 : vector<32x8xf32> to vector<32x8xbf16>
    %cst_50 = arith.constant dense<0.000000e+00> : vector<8x8xf32>
    %119 = tpu.matmul %118, %118, %cst_50 {dimension_numbers = #tpu.dot_dimension_numbers<[0], [0], [1], [1], [0, 1, 1, 1], [], []>} : vector<32x8xbf16>, vector<32x8xbf16>, vector<8x8xf32> -> vector<8x8xf32>
    %120 = arith.truncf %119 : vector<8x8xf32> to vector<8x8xbf16>
    %cst_51 = arith.constant dense<0.000000e+00> : vector<8x8xf32>
    %121 = tpu.matmul %120, %120, %cst_51 {dimension_numbers = #tpu.dot_dimension_numbers<[1], [0], [0], [1], [0, 0, 1, 1], [], []>} : vector<8x8xbf16>, vector<8x8xbf16>, vector<8x8xf32> -> vector<8x8xf32>
    %cst_52 = arith.constant -4.775000e+00 : f32
    %122 = vector.broadcast %cst_52 : f32 to vector<8x8xf32>
    %123 = arith.mulf %122, %119 : vector<8x8xf32>
    %cst_53 = arith.constant 2.031500e+00 : f32
    %124 = vector.broadcast %cst_53 : f32 to vector<8x8xf32>
    %125 = arith.mulf %124, %121 : vector<8x8xf32>
    %126 = arith.addf %123, %125 : vector<8x8xf32>
    %127 = arith.truncf %126 : vector<8x8xf32> to vector<8x8xbf16>
    %cst_54 = arith.constant 3.444500e+00 : f32
    %128 = vector.broadcast %cst_54 : f32 to vector<32x8xf32>
    %129 = arith.mulf %128, %117 : vector<32x8xf32>
    %cst_55 = arith.constant dense<0.000000e+00> : vector<32x8xf32>
    %130 = tpu.matmul %118, %127, %cst_55 {dimension_numbers = #tpu.dot_dimension_numbers<[1], [0], [0], [1], [0, 0, 1, 1], [], []>} : vector<32x8xbf16>, vector<8x8xbf16>, vector<32x8xf32> -> vector<32x8xf32>
    %131 = arith.addf %129, %130 : vector<32x8xf32>
    %132 = arith.truncf %131 : vector<32x8xf32> to vector<32x8xbf16>
    %cst_56 = arith.constant dense<0.000000e+00> : vector<8x8xf32>
    %133 = tpu.matmul %132, %132, %cst_56 {dimension_numbers = #tpu.dot_dimension_numbers<[0], [0], [1], [1], [0, 1, 1, 1], [], []>} : vector<32x8xbf16>, vector<32x8xbf16>, vector<8x8xf32> -> vector<8x8xf32>
    %134 = arith.truncf %133 : vector<8x8xf32> to vector<8x8xbf16>
    %cst_57 = arith.constant dense<0.000000e+00> : vector<8x8xf32>
    %135 = tpu.matmul %134, %134, %cst_57 {dimension_numbers = #tpu.dot_dimension_numbers<[1], [0], [0], [1], [0, 0, 1, 1], [], []>} : vector<8x8xbf16>, vector<8x8xbf16>, vector<8x8xf32> -> vector<8x8xf32>
    %cst_58 = arith.constant -4.775000e+00 : f32
    %136 = vector.broadcast %cst_58 : f32 to vector<8x8xf32>
    %137 = arith.mulf %136, %133 : vector<8x8xf32>
    %cst_59 = arith.constant 2.031500e+00 : f32
    %138 = vector.broadcast %cst_59 : f32 to vector<8x8xf32>
    %139 = arith.mulf %138, %135 : vector<8x8xf32>
    %140 = arith.addf %137, %139 : vector<8x8xf32>
    %141 = arith.truncf %140 : vector<8x8xf32> to vector<8x8xbf16>
    %cst_60 = arith.constant 3.444500e+00 : f32
    %142 = vector.broadcast %cst_60 : f32 to vector<32x8xf32>
    %143 = arith.mulf %142, %131 : vector<32x8xf32>
    %cst_61 = arith.constant dense<0.000000e+00> : vector<32x8xf32>
    %144 = tpu.matmul %132, %141, %cst_61 {dimension_numbers = #tpu.dot_dimension_numbers<[1], [0], [0], [1], [0, 0, 1, 1], [], []>} : vector<32x8xbf16>, vector<8x8xbf16>, vector<32x8xf32> -> vector<32x8xf32>
    %145 = arith.addf %143, %144 : vector<32x8xf32>
    %146 = arith.truncf %145 : vector<32x8xf32> to vector<32x8xbf16>
    %cst_62 = arith.constant dense<0.000000e+00> : vector<8x8xf32>
    %147 = tpu.matmul %146, %146, %cst_62 {dimension_numbers = #tpu.dot_dimension_numbers<[0], [0], [1], [1], [0, 1, 1, 1], [], []>} : vector<32x8xbf16>, vector<32x8xbf16>, vector<8x8xf32> -> vector<8x8xf32>
    %148 = arith.truncf %147 : vector<8x8xf32> to vector<8x8xbf16>
    %cst_63 = arith.constant dense<0.000000e+00> : vector<8x8xf32>
    %149 = tpu.matmul %148, %148, %cst_63 {dimension_numbers = #tpu.dot_dimension_numbers<[1], [0], [0], [1], [0, 0, 1, 1], [], []>} : vector<8x8xbf16>, vector<8x8xbf16>, vector<8x8xf32> -> vector<8x8xf32>
    %cst_64 = arith.constant -4.775000e+00 : f32
    %150 = vector.broadcast %cst_64 : f32 to vector<8x8xf32>
    %151 = arith.mulf %150, %147 : vector<8x8xf32>
    %cst_65 = arith.constant 2.031500e+00 : f32
    %152 = vector.broadcast %cst_65 : f32 to vector<8x8xf32>
    %153 = arith.mulf %152, %149 : vector<8x8xf32>
    %154 = arith.addf %151, %153 : vector<8x8xf32>
    %155 = arith.truncf %154 : vector<8x8xf32> to vector<8x8xbf16>
    %cst_66 = arith.constant 3.444500e+00 : f32
    %156 = vector.broadcast %cst_66 : f32 to vector<32x8xf32>
    %157 = arith.mulf %156, %145 : vector<32x8xf32>
    %cst_67 = arith.constant dense<0.000000e+00> : vector<32x8xf32>
    %158 = tpu.matmul %146, %155, %cst_67 {dimension_numbers = #tpu.dot_dimension_numbers<[1], [0], [0], [1], [0, 0, 1, 1], [], []>} : vector<32x8xbf16>, vector<8x8xbf16>, vector<32x8xf32> -> vector<32x8xf32>
    %159 = arith.addf %157, %158 : vector<32x8xf32>
    %cst_68 = arith.constant dense<0.000000e+00> : vector<8x8xf32>
    %160 = tpu.matmul %159, %159, %cst_68 {dimension_numbers = #tpu.dot_dimension_numbers<[0], [0], [1], [1], [0, 1, 1, 1], [], []>, precision = #tpu.contract_precision<fp32>} : vector<32x8xf32>, vector<32x8xf32>, vector<8x8xf32> -> vector<8x8xf32>
    %cst_69 = arith.constant 1.500000e+00 : f32
    %161 = vector.broadcast %cst_69 : f32 to vector<32x8xf32>
    %162 = arith.mulf %161, %159 : vector<32x8xf32>
    %cst_70 = arith.constant dense<0.000000e+00> : vector<32x8xf32>
    %163 = tpu.matmul %159, %160, %cst_70 {dimension_numbers = #tpu.dot_dimension_numbers<[1], [0], [0], [1], [0, 0, 1, 1], [], []>, precision = #tpu.contract_precision<fp32>} : vector<32x8xf32>, vector<8x8xf32>, vector<32x8xf32> -> vector<32x8xf32>
    %cst_71 = arith.constant 5.000000e-01 : f32
    %164 = vector.broadcast %cst_71 : f32 to vector<32x8xf32>
    %165 = arith.mulf %164, %163 : vector<32x8xf32>
    %166 = arith.subf %162, %165 : vector<32x8xf32>
    %cst_72 = arith.constant dense<0.000000e+00> : vector<8x8xf32>
    %167 = tpu.matmul %166, %166, %cst_72 {dimension_numbers = #tpu.dot_dimension_numbers<[0], [0], [1], [1], [0, 1, 1, 1], [], []>, precision = #tpu.contract_precision<fp32>} : vector<32x8xf32>, vector<32x8xf32>, vector<8x8xf32> -> vector<8x8xf32>
    %cst_73 = arith.constant 1.500000e+00 : f32
    %168 = vector.broadcast %cst_73 : f32 to vector<32x8xf32>
    %169 = arith.mulf %168, %166 : vector<32x8xf32>
    %cst_74 = arith.constant dense<0.000000e+00> : vector<32x8xf32>
    %170 = tpu.matmul %166, %167, %cst_74 {dimension_numbers = #tpu.dot_dimension_numbers<[1], [0], [0], [1], [0, 0, 1, 1], [], []>, precision = #tpu.contract_precision<fp32>} : vector<32x8xf32>, vector<8x8xf32>, vector<32x8xf32> -> vector<32x8xf32>
    %cst_75 = arith.constant 5.000000e-01 : f32
    %171 = vector.broadcast %cst_75 : f32 to vector<32x8xf32>
    %172 = arith.mulf %171, %170 : vector<32x8xf32>
    %173 = arith.subf %169, %172 : vector<32x8xf32>
    %cst_76 = arith.constant dense<0.000000e+00> : vector<8x8xf32>
    %174 = tpu.matmul %173, %173, %cst_76 {dimension_numbers = #tpu.dot_dimension_numbers<[0], [0], [1], [1], [0, 1, 1, 1], [], []>, precision = #tpu.contract_precision<fp32>} : vector<32x8xf32>, vector<32x8xf32>, vector<8x8xf32> -> vector<8x8xf32>
    %cst_77 = arith.constant 1.500000e+00 : f32
    %175 = vector.broadcast %cst_77 : f32 to vector<32x8xf32>
    %176 = arith.mulf %175, %173 : vector<32x8xf32>
    %cst_78 = arith.constant dense<0.000000e+00> : vector<32x8xf32>
    %177 = tpu.matmul %173, %174, %cst_78 {dimension_numbers = #tpu.dot_dimension_numbers<[1], [0], [0], [1], [0, 0, 1, 1], [], []>, precision = #tpu.contract_precision<fp32>} : vector<32x8xf32>, vector<8x8xf32>, vector<32x8xf32> -> vector<32x8xf32>
    %cst_79 = arith.constant 5.000000e-01 : f32
    %178 = vector.broadcast %cst_79 : f32 to vector<32x8xf32>
    %179 = arith.mulf %178, %177 : vector<32x8xf32>
    %180 = arith.subf %176, %179 : vector<32x8xf32>
    %cst_80 = arith.constant dense<0.000000e+00> : vector<8x8xf32>
    %181 = tpu.matmul %180, %180, %cst_80 {dimension_numbers = #tpu.dot_dimension_numbers<[0], [0], [1], [1], [0, 1, 1, 1], [], []>, precision = #tpu.contract_precision<fp32>} : vector<32x8xf32>, vector<32x8xf32>, vector<8x8xf32> -> vector<8x8xf32>
    %cst_81 = arith.constant 1.500000e+00 : f32
    %182 = vector.broadcast %cst_81 : f32 to vector<32x8xf32>
    %183 = arith.mulf %182, %180 : vector<32x8xf32>
    %cst_82 = arith.constant dense<0.000000e+00> : vector<32x8xf32>
    %184 = tpu.matmul %180, %181, %cst_82 {dimension_numbers = #tpu.dot_dimension_numbers<[1], [0], [0], [1], [0, 0, 1, 1], [], []>, precision = #tpu.contract_precision<fp32>} : vector<32x8xf32>, vector<8x8xf32>, vector<32x8xf32> -> vector<32x8xf32>
    %cst_83 = arith.constant 5.000000e-01 : f32
    %185 = vector.broadcast %cst_83 : f32 to vector<32x8xf32>
    %186 = arith.mulf %185, %184 : vector<32x8xf32>
    %187 = arith.subf %183, %186 : vector<32x8xf32>
    %c0_84 = arith.constant 0 : index
    %c0_85 = arith.constant 0 : index
    %188 = vector.load %arg3[%c0_84, %c0_85] : memref<32x8xf32, #tpu.memory_space<vmem>>, vector<32x8xf32>
    tpu.vector_store %arg3[%c0_84, %c0_85], %187 {strides = array<i32>} : memref<32x8xf32, #tpu.memory_space<vmem>>, vector<32x8xf32>,
    return
  }
}

</mosaic_0001>

<bundles_post_ra>
// kernel: tpu_custom_call.1
= control target key start
LH: loop header
LB: loop body
LE: loop exit
PB: predicated region body
PF: predicated region fallthrough
CT: control target
= control target key end

     0   :  { %vm25_vm0 = vcmask 64512   ;;  %v9294_v51 = vmov 0.0|0.0   ;;  %vm9295_vm1 = vmmov 0   ;;  %vm121_vm2 = vcmask 261120   ;;  %s9884_s1 = inlined_call_operand.vmem [shape: f32[32,8], index: 1, kind: input, shape index: {}]   ;;  %s9885_s2 = inlined_call_operand.vmem [shape: f32[32,8], index: 2, kind: input, shape index: {}]   ;;  %s9886_s0 = inlined_call_operand.<no memory space> [shape: f32[1], index: 0, kind: input, shape index: {}]   ;;  %s9887_s3 = inlined_call_operand.vmem [shape: f32[32,8], index: 3, kind: output, shape index: {}]  }
   0x1   :  { %v16_v0 = vld [vmem:[%s9884_s1] sm:$0xff]  ;;  %v18_v1 = vld [vmem:[%s9884_s1 + $0x10] sm:$0xff]  ;;  %v17_v2 = vld [vmem:[%s9884_s1 + $0x8] sm:$0xff]  ;;  %v51_v10 = vstv %s9886_s0  ;;  %8935 = vmatprep.subr.bf16.mxu0 %v9294_v51  ;;  %vm1722_vm3 = vcmask 1043456  }
   0x2   :  { %v26_v3 = vsel %vm25_vm0, %v16_v0, 0.0  ;;  %v32_v4 = vsel %vm25_vm0, %v18_v1, 0.0  ;;  %v19_v5 = vld [vmem:[%s9884_s1 + $0x18] sm:$0xff]  ;;  %v29_v6 = vsel %vm25_vm0, %v17_v2, 0.0  ;;  %v20_v8 = vld [vmem:[%s9885_s2] sm:$0xff]  ;;  %v22_v13 = vld [vmem:[%s9885_s2 + $0x10] sm:$0xff] }
   0x3   :  { %27 = vadd.xlane.f32.xlu0 %v26_v3  ;;  %33 = vadd.xlane.f32.xlu1 %v32_v4  ;;  %v35_v7 = vsel %vm25_vm0, %v19_v5, 0.0  ;;  %v52_v16 = vmul.f32 %v51_v10, %v20_v8  ;;  %v21_v18 = vld [vmem:[%s9885_s2 + $0x8] sm:$0xff]  ;;  %v54_v19 = vmul.f32 %v51_v10, %v22_v13  ;;  %v23_v21 = vld [vmem:[%s9885_s2 + $0x18] sm:$0xff] }
   0x4   :  { %v53_v27 = vmul.f32 %v51_v10, %v21_v18  ;;  %v55_v31 = vmul.f32 %v51_v10, %v23_v21 }
   0x7   :  { %30 = vadd.xlane.f32.xlu0 %v29_v6  ;;  %36 = vadd.xlane.f32.xlu1 %v35_v7 }
  0x90   :  { %v28_v9 = vpop.xlane.xlu0 %27  ;;  %v34_v11 = vpop.xlane.xlu1 %33 }
  0x91   :  { %v39_v12 = vmul.f32 0.125, %v28_v9  ;;  %v41_v14 = vmul.f32 0.125, %v34_v11 }
  0x93   :  { %v43_v15 = vsub.f32 %v16_v0, %v39_v12  ;;  %v45_v17 = vsub.f32 %v18_v1, %v41_v14 }
  0x94   :  { %v31_v20 = vpop.xlane.xlu0 %30  ;;  %v37_v22 = vpop.xlane.xlu1 %36 }
  0x95   :  { %v47_v23 = vmul.f32 0.75592893, %v43_v15  ;;  %v49_v24 = vmul.f32 0.75592893, %v45_v17  ;;  %v40_v25 = vmul.f32 0.125, %v31_v20  ;;  %v42_v26 = vmul.f32 0.125, %v37_v22 }
  0x96   :  { %v9296_v17 = vmov 0.0  }
  0x97   :  { %v56_v28 = vadd.f32 %v52_v16, %v47_v23  ;;  %v44_v29 = vsub.f32 %v17_v2, %v40_v25  ;;  %v46_v30 = vsub.f32 %v19_v5, %v42_v26  ;;  %v58_v32 = vadd.f32 %v54_v19, %v49_v24  ;;  %8163 = vmatprep.mubr.msk.f32.mxu0 %vm9295_vm1, %v9296_v17 }
  0x98   :  { %8221 = vmatprep.subr.mxu1 %v9296_v17  ;;  %8223 = vmatprep.mubr.msk.f32.mxu1 %vm9295_vm1, %v9296_v17 }
  0x99   :  { %v48_v33 = vmul.f32 0.75592893, %v44_v29  ;;  %v50_v34 = vmul.f32 0.75592893, %v46_v30  ;;  %v60_v35 = vmul.f32 %v56_v28, %v56_v28  ;;  %v62_v39 = vmul.f32 %v58_v32, %v58_v32 }
  0x9b   :  { %v57_v36 = vadd.f32 %v53_v27, %v48_v33  ;;  %v59_v37 = vadd.f32 %v55_v31, %v50_v34  ;;  %v64_v41 = vsel %vm25_vm0, %v60_v35, 0.0  ;;  %v67_v44 = vsel %vm25_vm0, %v62_v39, 0.0 }
  0x9d   :  { %v61_v38 = vmul.f32 %v57_v36, %v57_v36  ;;  %v63_v40 = vmul.f32 %v59_v37, %v59_v37 }
  0x9f   :  { %v65_v42 = vsel %vm25_vm0, %v61_v38, 0.0  ;;  %v69_v45 = vsel %vm25_vm0, %v63_v40, 0.0 }
  0xa0   :  { %v66_v43 = vadd.f32 %v65_v42, %v64_v41 }
  0xa2   :  { %v68_v46 = vadd.f32 %v67_v44, %v66_v43 }
  0xa4   :  { %v70_v47 = vadd.f32 %v69_v45, %v68_v46 }
  0xa6   :  { %71 = vadd.xlane.f32.xlu0 %v70_v47 }
 0x133   :  { %v72_v48 = vpop.xlane.xlu0 %71 }
 0x134   :  { %v73_v49 = vrot.slane %v72_v48, 4 }
 0x136   :  { %v74_v50 = vadd.f32 %v73_v49, %v72_v48 }
 0x138   :  { %v75_v52 = vrot.slane %v74_v50, 2 }
 0x13a   :  { %v76_v53 = vadd.f32 %v75_v52, %v74_v50 }
 0x13c   :  { %v77_v54 = vrot.slane %v76_v53, 1 }
 0x13e   :  { %v78_v55 = vadd.f32 %v77_v54, %v76_v53 }
 0x140   :  { %9284 = vpush %v78_v55 }
 0x171   :  { %s9285_s0 = spop %9284 }
 0x172   :  { %s80_s2 = sadd.f32 1e-30, %s9285_s0 }
 0x174   :  { %v81_v56 = vstv %s80_s2 }
 0x175   :  { %9292 = vrsqrt.f32 %v81_v56 }
 0x17f   :  { %v9293_v57 = vpop.eup %9292 }
 0x180   :  { %9286 = vpush %v9293_v57 }
 0x1b1   :  { %s9287_s29 = spop %9286 }
 0x1b2   :  { %v84_v58 = vstv %s9287_s29 }
 0x1b3   :  { %v9353_v59 = vmul.f32 %v84_v58, %v56_v28  ;;  %v9355_v60 = vmul.f32 %v84_v58, %v57_v36  ;;  %v9357_v61 = vmul.f32 %v84_v58, %v58_v32  ;;  %v9359_v62 = vmul.f32 %v84_v58, %v59_v37 }
 0x1b5   :  { %89 = vxpose.xlu1.b32.start [1/4] (short) (narrow) %v9353_v59, 8  ;;  %v126_v63 = vand.u32 4294901760, %v9353_v59  ;;  %v129_v0 = vand.u32 4294901760, %v9355_v60  ;;  %v132_v1 = vand.u32 4294901760, %v9357_v61  ;;  %v135_v2 = vand.u32 4294901760, %v9359_v62 }
 0x1b6   :  { %v1067_v48 = vsel %vm25_vm0, %v9353_v59, 0  ;;  %v1070_v55 = vsel %vm25_vm0, %v9355_v60, 0  ;;  %v1073_v56 = vsel %vm25_vm0, %v9357_v61, 0 }
 0x1b7   :  { %v9366_v3 = vpack.c.bf16 %v129_v0, %v126_v63  ;;  %v206_v4 = vsub.f32 %v9353_v59, %v126_v63  ;;  %v213_v5 = vsub.f32 %v9355_v60, %v129_v0  ;;  %v220_v6 = vsub.f32 %v9357_v61, %v132_v1 }
 0x1b8   :  { %v227_v7 = vsub.f32 %v9359_v62, %v135_v2  ;;  %v8939_v11 = vpack.c.bf16 %v135_v2, %v132_v1  ;;  %v9421_v49 = vand.u32 4294901760, %v1067_v48  ;;  %v1154_v57 = vand.u32 4294901760, %v1070_v55 }
 0x1b9   :  { %90 = vxpose.xlu1.b32.cont [2/4] (short) (narrow) %v9355_v60, 8  ;;  %8937 = vmatpush3.bf16.msra.mxu0 %v9366_v3  ;;  %v207_v8 = vand.u32 4294901760, %v206_v4  ;;  %v214_v9 = vand.u32 4294901760, %v213_v5  ;;  %v8948_v10 = vpack.c.bf16 %v213_v5, %v206_v4  ;;  %v221_v12 = vand.u32 4294901760, %v220_v6 }
 0x1ba   :  { %8938 = vmatprep.subr.bf16.mxu0 %v9294_v51  ;;  %v228_v13 = vand.u32 4294901760, %v227_v7  ;;  %v8951_v14 = vpack.c.bf16 %v227_v7, %v220_v6  ;;  %v1145_v50 = vsub.f32 %v1067_v48, %v9421_v49  ;;  %v1164_v58 = vand.u32 4294901760, %v1073_v56 }
 0x1bb   :  { %v208_v15 = vsub.f32 %v206_v4, %v207_v8  ;;  %v215_v16 = vsub.f32 %v213_v5, %v214_v9  ;;  %v222_v18 = vsub.f32 %v220_v6, %v221_v12  ;;  %v8960_v20 = vpack.c.bf16 %v214_v9, %v207_v8 }
 0x1bc   :  { %v229_v19 = vsub.f32 %v227_v7, %v228_v13  ;;  %v8963_v21 = vpack.c.bf16 %v228_v13, %v221_v12  ;;  %v1146_v52 = vand.u32 4294901760, %v1145_v50  ;;  %v1076_v63 = vsel %vm25_vm0, %v9359_v62, 0 }
 0x1bd   :  { %91 = vxpose.xlu1.b32.cont [3/4] (short) (narrow) %v9357_v61, 8  ;;  %8940 = vmatpush3.bf16.msra.mxu0 %v8939_v11  ;;  %v209_v22 = vand.u32 4294901760, %v208_v15  ;;  %v216_v23 = vand.u32 4294901760, %v215_v16  ;;  %v223_v24 = vand.u32 4294901760, %v222_v18  ;;  %v1155_v0 = vsub.f32 %v1070_v55, %v1154_v57 }
 0x1be   :  { %8941 = vmatprep.subr.bf16.mxu0 %v9294_v51  ;;  %v230_v25 = vand.u32 4294901760, %v229_v19  ;;  %v1147_v53 = vsub.f32 %v1145_v50, %v1146_v52  ;;  %v1174_v1 = vand.u32 4294901760, %v1076_v63  ;;  %v1165_v2 = vsub.f32 %v1073_v56, %v1164_v58 }
 0x1bf   :  { %v8942_v26 = vpack.c.bf16 %v216_v23, %v209_v22 }
 0x1c0   :  { %v8945_v27 = vpack.c.bf16 %v230_v25, %v223_v24  ;;  %v1148_v54 = vand.u32 4294901760, %v1147_v53  ;;  %v1175_v4 = vsub.f32 %v1076_v63, %v1174_v1  ;;  %v1166_v6 = vand.u32 4294901760, %v1165_v2 }
 0x1c1   :  { %92 = vxpose.xlu1.b32.end [4/4] (short) (narrow) %v9359_v62, 8  ;;  %v1063_v24 = vmul.f32 3.4445, %v9355_v60 }
 0x1c2   :  { %v1176_v12 = vand.u32 4294901760, %v1175_v4  ;;  %v1167_v13 = vsub.f32 %v1165_v2, %v1166_v6 }
 0x1c4   :  { %v1177_v18 = vsub.f32 %v1175_v4, %v1176_v12  ;;  %v1168_v19 = vand.u32 4294901760, %v1167_v13 }
 0x235   :  { %v105_v28 = vpop.trf.xlu1 }
 0x236   :  { %v123_v29 = vsel %vm121_vm2, %v105_v28, 0 }
 0x237   :  { %v194_v30 = vand.u32 4294901760, %v123_v29 }
 0x239   :  { %v195_v31 = vsub.f32 %v123_v29, %v194_v30 }
 0x23b   :  { %v196_v32 = vand.u32 4294901760, %v195_v31 }
 0x23d   :  { %v197_v33 = vsub.f32 %v195_v31, %v196_v32 }
 0x23f   :  { %v198_v34 = vand.u32 4294901760, %v197_v33  ;;  %v1064_v33 = vmul.f32 3.4445, %v9357_v61 }
 0x241   :  { %8164 = vmatmul.mubr.f32.vlgmr.msra.gmra.mrb[0].mxu0 %v198_v34 }
 0x242   :  { %8943 = vmatpush3.bf16.msra.mxu0 %v8942_v26  ;;  %8174 = vmatprep.mubr.msk.f32.mxu0 %vm9295_vm1, %v9296_v17  ;;  %v1062_v26 = vmul.f32 3.4445, %v9353_v59 }
 0x243   :  { %8944 = vmatprep.subr.bf16.mxu0 %v9294_v51 }
 0x246   :  { %8946 = vmatpush3.bf16.msra.mxu0 %v8945_v27 }
 0x247   :  { %8947 = vmatprep.subr.bf16.mxu0 %v9294_v51 }
 0x249   :  { %8175 = vmatmul.mubr.f32.vlgmr.msra.gmra.mrb[0].mxu0 %v194_v30 }
 0x24a   :  { %8949 = vmatpush3.bf16.msra.mxu0 %v8948_v10  ;;  %8185 = vmatprep.mubr.msk.f32.mxu0 %vm9295_vm1, %v9296_v17 }
 0x24b   :  { %8950 = vmatprep.subr.bf16.mxu0 %v9294_v51 }
 0x24e   :  { %8952 = vmatpush3.bf16.msra.mxu0 %v8951_v14 }
 0x24f   :  { %8953 = vmatprep.subr.bf16.mxu0 %v9294_v51 }
 0x251   :  { %8186 = vmatmul.mubr.f32.vlgmr.msra.gmra.mrb[0].mxu0 %v195_v31 }
 0x252   :  { %8955 = vmatpush3.bf16.msra.mxu0 %v9366_v3  ;;  %8196 = vmatprep.mubr.msk.f32.mxu0 %vm9295_vm1, %v9296_v17 }
 0x253   :  { %8956 = vmatprep.subr.bf16.mxu0 %v9294_v51 }
 0x256   :  { %8958 = vmatpush3.bf16.msra.mxu0 %v8939_v11 }
 0x257   :  { %8959 = vmatprep.subr.bf16.mxu0 %v9294_v51 }
 0x259   :  { %8197 = vmatmul.mubr.f32.vlgmr.msra.gmra.mrb[0].mxu0 %v196_v32 }
 0x25a   :  { %8961 = vmatpush3.bf16.msra.mxu0 %v8960_v20  ;;  %8207 = vmatprep.mubr.msk.f32.mxu0 %vm9295_vm1, %v9296_v17 }
 0x25b   :  { %8962 = vmatprep.subr.bf16.mxu0 %v9294_v51 }
 0x25e   :  { %8964 = vmatpush3.bf16.msra.mxu0 %v8963_v21  ;;  %v1178_v21 = vand.u32 4294901760, %v1177_v18 }
 0x25f   :  { %8965 = vmatprep.subr.bf16.mxu0 %v9294_v51 }
 0x261   :  { %8208 = vmatmul.mubr.f32.vlgmr.msra.gmra.mrb[0].mxu0 %v194_v30 }
 0x262   :  { %8967 = vmatpush3.bf16.msra.mxu0 %v9366_v3  ;;  %8218 = vmatprep.mubr.msk.f32.mxu0 %vm9295_vm1, %v9296_v17  ;;  %v1156_v3 = vand.u32 4294901760, %v1155_v0 }
 0x263   :  { %8968 = vmatprep.subr.bf16.mxu0 %v9294_v51 }
 0x266   :  { %8970 = vmatpush3.bf16.msra.mxu0 %v8939_v11  ;;  %v1157_v11 = vsub.f32 %v1155_v0, %v1156_v3 }
 0x267   :  { %8299 = vmatprep.subr.bf16.mxu0 %v9296_v17 }
 0x268   :  { %v1158_v16 = vand.u32 4294901760, %v1157_v11 }
 0x269   :  { %8219 = vmatmul.mubr.f32.vlgmr.msra.gmra.mrb[0].mxu0 %v194_v30  ;;  %v1065_v30 = vmul.f32 3.4445, %v9359_v62 }
 0x26a   :  { %8303 = vmatprep.mubr.msk.bf16.mxu0 %vm9295_vm1, %v9296_v17 }
 0x33c   :  { %v606_v35 = vpop.f32.mrb[0].mxu0 }
 0x33d   :  { %v611_v36 = vsel %vm25_vm0, %v606_v35, 0  ;;  %v614_v37 = vand.u32 4294901760, %v606_v35  ;;  %v8220_v38 = vpop.f32.mrb[1].mxu0  ;;  %v1059_v7 = vmul.f32 -4.775, %v606_v35 }
 0x33e   :  { %v679_v39 = vand.u32 4294901760, %v611_v36 }
 0x33f   :  { %v691_v40 = vsub.f32 %v606_v35, %v614_v37  ;;  %8222 = vmatpush3.msra.mxu1 %v614_v37 }
 0x340   :  { %v680_v41 = vsub.f32 %v611_v36, %v679_v39  ;;  %8226 = vmatprep.subr.mxu1 %v9296_v17 }
 0x341   :  { %v692_v42 = vand.u32 4294901760, %v691_v40 }
 0x342   :  { %v681_v43 = vand.u32 4294901760, %v680_v41 }
 0x343   :  { %v693_v44 = vsub.f32 %v691_v40, %v692_v42 }
 0x344   :  { %v682_v45 = vsub.f32 %v680_v41, %v681_v43 }
 0x345   :  { %v694_v46 = vand.u32 4294901760, %v693_v44 }
 0x346   :  { %v683_v47 = vand.u32 4294901760, %v682_v45 }
 0x348   :  { %8224 = vmatmul.mubr.f32.vlgmr.msra.gmra.mrb[0].mxu1 %v683_v47 }
 0x349   :  { %8227 = vmatpush3.msra.mxu1 %v694_v46  ;;  %8228 = vmatprep.mubr.msk.f32.mxu1 %vm9295_vm1, %v9296_v17 }
 0x34a   :  { %8231 = vmatprep.subr.mxu1 %v9296_v17 }
 0x350   :  { %8229 = vmatmul.mubr.f32.vlgmr.msra.gmra.mrb[0].mxu1 %v679_v39 }
 0x351   :  { %8232 = vmatpush3.msra.mxu1 %v691_v40  ;;  %8233 = vmatprep.mubr.msk.f32.mxu1 %vm9295_vm1, %v9296_v17 }
 0x352   :  { %8236 = vmatprep.subr.mxu1 %v9296_v17 }
 0x358   :  { %8234 = vmatmul.mubr.f32.vlgmr.msra.gmra.mrb[0].mxu1 %v680_v41 }
 0x359   :  { %8237 = vmatpush3.msra.mxu1 %v614_v37  ;;  %8238 = vmatprep.mubr.msk.f32.mxu1 %vm9295_vm1, %v9296_v17 }
 0x35a   :  { %8241 = vmatprep.subr.mxu1 %v9296_v17 }
 0x360   :  { %8239 = vmatmul.mubr.f32.vlgmr.msra.gmra.mrb[0].mxu1 %v681_v43 }
 0x361   :  { %8242 = vmatpush3.msra.mxu1 %v692_v42  ;;  %8243 = vmatprep.mubr.msk.f32.mxu1 %vm9295_vm1, %v9296_v17 }
 0x362   :  { %8246 = vmatprep.subr.mxu1 %v9296_v17 }
 0x368   :  { %8244 = vmatmul.mubr.f32.vlgmr.msra.gmra.mrb[0].mxu1 %v679_v39 }
 0x369   :  { %8247 = vmatpush3.msra.mxu1 %v614_v37  ;;  %8248 = vmatprep.mubr.msk.f32.mxu1 %vm9295_vm1, %v9296_v17 }
 0x370   :  { %8249 = vmatmul.mubr.f32.vlgmr.msra.gmra.mrb[0].mxu1 %v679_v39 }
 0x371   :  { %8253 = vmatprep.mubr.f32.mxu1 %v1148_v54 }
 0x443   :  { %v1055_v5 = vpop.f32.mrb[0].mxu1 }
 0x444   :  { %v1060_v8 = vmul.f32 2.0315, %v1055_v5  ;;  %v8250_v9 = vpop.f32.mrb[1].mxu1 }
 0x446   :  { %v1061_v10 = vadd.f32 %v1060_v8, %v1059_v7 }
 0x448   :  { %v1079_v14 = vand.u32 4294901760, %v1061_v10 }
 0x44a   :  { %v1186_v15 = vsub.f32 %v1061_v10, %v1079_v14  ;;  %8251 = vmatprep.subr.mxu1 %v1079_v14 }
 0x44b   :  { %8252 = vmatpush3.msra.mxu1 %v1079_v14 }
 0x44c   :  { %8254 = vmatmul.mubr.f32.vlgmr.msra.gmra.mrb[2].mxu1 %v1158_v16  ;;  %v1187_v20 = vand.u32 4294901760, %v1186_v15 }
 0x44d   :  { %8256 = vmatprep.mubr.f32.mxu1 %v1168_v19 }
 0x44e   :  { %v1188_v22 = vsub.f32 %v1186_v15, %v1187_v20 }
 0x450   :  { %8257 = vmatmul.mubr.f32.gmra.mrb[4].mxu1 %v1178_v21  ;;  %v1189_v23 = vand.u32 4294901760, %v1188_v22 }
 0x451   :  { %8261 = vmatprep.mubr.f32.mxu1 %v9421_v49 }
 0x452   :  { %8259 = vmatprep.subr.mxu1 %v1189_v23 }
 0x453   :  { %8260 = vmatpush3.msra.mxu1 %v1189_v23 }
 0x454   :  { %8262 = vmatmul.mubr.f32.vlgmr.msra.gmra.mrb[2].mxu1 %v1154_v57  ;;  %8267 = vmatprep.subr.mxu1 %v1186_v15 }
 0x455   :  { %8264 = vmatprep.mubr.f32.mxu1 %v1164_v58  ;;  %8268 = vmatpush3.msra.mxu1 %v1186_v15 }
 0x456   :  { %8275 = vmatprep.subr.mxu1 %v1079_v14 }
 0x458   :  { %8265 = vmatmul.mubr.f32.gmra.mrb[4].mxu1 %v1174_v1 }
 0x459   :  { %8269 = vmatprep.mubr.f32.mxu1 %v1145_v50 }
 0x45c   :  { %8270 = vmatmul.mubr.f32.vlgmr.msra.gmra.mrb[2].mxu1 %v1155_v0 }
 0x45d   :  { %8276 = vmatpush3.msra.mxu1 %v1079_v14  ;;  %8272 = vmatprep.mubr.f32.mxu1 %v1165_v2 }
 0x45e   :  { %8283 = vmatprep.subr.mxu1 %v1187_v20 }
 0x460   :  { %8273 = vmatmul.mubr.f32.gmra.mrb[4].mxu1 %v1175_v4 }
 0x461   :  { %8277 = vmatprep.mubr.f32.mxu1 %v1146_v52 }
 0x464   :  { %8278 = vmatmul.mubr.f32.vlgmr.msra.gmra.mrb[2].mxu1 %v1156_v3 }
 0x465   :  { %8284 = vmatpush3.msra.mxu1 %v1187_v20  ;;  %8280 = vmatprep.mubr.f32.mxu1 %v1166_v6 }
 0x466   :  { %8291 = vmatprep.subr.mxu1 %v1079_v14 }
 0x468   :  { %8281 = vmatmul.mubr.f32.gmra.mrb[4].mxu1 %v1176_v12 }
 0x469   :  { %8285 = vmatprep.mubr.f32.mxu1 %v9421_v49 }
 0x46c   :  { %8286 = vmatmul.mubr.f32.vlgmr.msra.gmra.mrb[2].mxu1 %v1154_v57 }
 0x46d   :  { %8292 = vmatpush3.msra.mxu1 %v1079_v14  ;;  %8288 = vmatprep.mubr.f32.mxu1 %v1164_v58 }
 0x46e   :  { %8319 = vmatprep.subr.bf16.mxu1 %v9296_v17 }
 0x470   :  { %8289 = vmatmul.mubr.f32.gmra.mrb[4].mxu1 %v1174_v1 }
 0x471   :  { %8293 = vmatprep.mubr.f32.mxu1 %v9421_v49 }
 0x474   :  { %8294 = vmatmul.mubr.f32.vlgmr.msra.gmra.mrb[2].mxu1 %v1154_v57 }
 0x475   :  { %8296 = vmatprep.mubr.f32.mxu1 %v1164_v58 }
 0x478   :  { %8297 = vmatmul.mubr.f32.gmra.mrb[4].mxu1 %v1174_v1 }
 0x479   :  { %8323 = vmatprep.mubr.msk.bf16.mxu1 %vm9295_vm1, %v9296_v17 }
 0x547   :  { %v8295_v25 = vpop.f32.mrb[2].mxu1 }
 0x548   :  { %v1654_v27 = vadd.f32 %v8295_v25, %v1063_v24  ;;  %v1631_v28 = vpop.f32.mrb[3].mxu1 }
 0x549   :  { %v1653_v29 = vadd.f32 %v1631_v28, %v1062_v26 }
 0x54a   :  { %v1770_v63 = vmul.f32 3.4445, %v1654_v27 }
 0x54b   :  { %v1657_v31 = vpack.c.bf16 %v1654_v27, %v1653_v29  ;;  %v8298_v32 = vpop.f32.mrb[4].mxu1  ;;  %v1769_v53 = vmul.f32 3.4445, %v1653_v29 }
 0x54c   :  { %v1656_v34 = vadd.f32 %v8298_v32, %v1065_v30  ;;  %v1643_v35 = vpop.f32.mrb[5].mxu1 }
 0x54d   :  { %v1655_v36 = vadd.f32 %v1643_v35, %v1064_v33  ;;  %1659 = vxpose.xlu0.c.b16.start [1/2] (short) (narrow) %v1657_v31, 16  ;;  %8300 = vmatpush3.bf16.msra.mxu0 %v1657_v31 }
 0x54e   :  { %8301 = vmatprep.subr.bf16.mxu0 %v9296_v17  ;;  %v1772_v56 = vmul.f32 3.4445, %v1656_v34 }
 0x54f   :  { %v1658_v60 = vpack.c.bf16 %v1656_v34, %v1655_v36  ;;  %v1771_v50 = vmul.f32 3.4445, %v1655_v36 }
 0x551   :  { %1660 = vxpose.xlu0.c.b16.end [2/2] (short) (narrow) %v1658_v60, 16  ;;  %8302 = vmatpush3.bf16.msra.mxu0 %v1658_v60 }
 0x552   :  { %8307 = vmatprep.subr.bf16.mxu0 %v9296_v17 }
 0x5b3   :  { %v1667_v59 = vpop.trf.xlu0 }
 0x5b4   :  { %8304 = vmatmul.mubr.msk.bf16.vlgmr.msra.gmra.mrb[4].mxu0 %vm121_vm2, %v1667_v59 }
 0x5b5   :  { %8309 = vmatprep.mubr.msk.bf16.mxu0 %vm9295_vm1, %v9296_v17 }
 0x687   :  { %v1712_v62 = vpop.f32.mrb[4].mxu0 }
 0x688   :  { %v1718_v61 = vpack.c.bf16 %v1712_v62, %v1712_v62  ;;  %v8305_v37 = vpop.f32.mrb[5].mxu0  ;;  %v1765_v42 = vmul.f32 -4.775, %v1712_v62 }
 0x689   :  { %v1715_v38 = vpop.f32.mrb[6].mxu0 }
 0x68a   :  { %v8306_v39 = vpop.f32.mrb[7].mxu0  ;;  %v1723_v40 = vsel %vm1722_vm3, %v1718_v61, 0 }
 0x68b   :  { %8308 = vmatpush3.bf16.msra.mxu0 %v1723_v40 }
 0x68e   :  { %8310 = vmatmul.mubr.msk.bf16.vlgmr.msra.gmra.mrb[8].mxu0 %vm25_vm0, %v1718_v61 }
 0x68f   :  { %8315 = vmatprep.mubr.msk.bf16.mxu0 %vm25_vm0, %v1657_v31 }
 0x761   :  { %v1759_v41 = vpop.f32.mrb[8].mxu0 }
 0x762   :  { %v1766_v43 = vmul.f32 2.0315, %v1759_v41  ;;  %v8311_v44 = vpop.f32.mrb[9].mxu0 }
 0x763   :  { %v1762_v45 = vpop.f32.mrb[10].mxu0 }
 0x764   :  { %v1767_v46 = vadd.f32 %v1766_v43, %v1765_v42  ;;  %v8312_v47 = vpop.f32.mrb[11].mxu0 }
 0x766   :  { %v1768_v48 = vpack.c.bf16 %v1767_v46, %v1767_v46 }
 0x768   :  { %9275 = vmatprep.subr.msk.bf16.mxu0 %vm1722_vm3, %v1768_v48  ;;  %v1780_v49 = vsel %vm1722_vm3, %v1768_v48, 0 }
 0x769   :  { %8314 = vmatpush3.bf16.msra.mxu0 %v1780_v49 }
 0x76a   :  { %8327 = vmatprep.subr.bf16.mxu0 %v9296_v17 }
 0x76c   :  { %8316 = vmatmul.mubr.msk.bf16.vlgmr.msra.gmra.mrb[12].mxu0 %vm25_vm0, %v1658_v60 }
 0x76d   :  { %8329 = vmatprep.mubr.msk.bf16.mxu0 %vm9295_vm1, %v9296_v17 }
 0x83f   :  { %v8317_v52 = vpop.f32.mrb[12].mxu0 }
 0x840   :  { %v1833_v54 = vadd.f32 %v8317_v52, %v1771_v50  ;;  %v1816_v55 = vpop.f32.mrb[13].mxu0 }
 0x841   :  { %v1831_v57 = vadd.f32 %v1816_v55, %v1769_v53  ;;  %v8318_v58 = vpop.f32.mrb[14].mxu0 }
 0x842   :  { %v1834_v0 = vadd.f32 %v8318_v58, %v1772_v56  ;;  %v1819_v1 = vpop.f32.mrb[15].mxu0  ;;  %v1948_v22 = vmul.f32 3.4445, %v1833_v54 }
 0x843   :  { %v1832_v2 = vadd.f32 %v1819_v1, %v1770_v63  ;;  %v1946_v24 = vmul.f32 3.4445, %v1831_v57 }
 0x844   :  { %v1836_v3 = vpack.c.bf16 %v1834_v0, %v1833_v54  ;;  %v1949_v27 = vmul.f32 3.4445, %v1834_v0 }
 0x845   :  { %v1835_v4 = vpack.c.bf16 %v1832_v2, %v1831_v57  ;;  %v1947_v30 = vmul.f32 3.4445, %v1832_v2 }
 0x847   :  { %1837 = vxpose.xlu0.c.b16.start [1/2] (short) (narrow) %v1835_v4, 16  ;;  %8320 = vmatpush3.bf16.msra.mxu1 %v1835_v4 }
 0x848   :  { %8321 = vmatprep.subr.bf16.mxu1 %v9296_v17 }
 0x84b   :  { %1838 = vxpose.xlu0.c.b16.end [2/2] (short) (narrow) %v1836_v3, 16  ;;  %8322 = vmatpush3.bf16.msra.mxu1 %v1836_v3 }
 0x8ad   :  { %v1845_v5 = vpop.trf.xlu0 }
 0x8ae   :  { %8324 = vmatmul.mubr.msk.bf16.vlgmr.msra.gmra.mrb[8].mxu1 %vm121_vm2, %v1845_v5 }
 0x8af   :  { %8335 = vmatprep.mubr.msk.bf16.mxu1 %vm25_vm0, %v1835_v4 }
 0x981   :  { %v1890_v6 = vpop.f32.mrb[8].mxu1 }
 0x982   :  { %v1896_v7 = vpack.c.bf16 %v1890_v6, %v1890_v6  ;;  %v8325_v8 = vpop.f32.mrb[9].mxu1  ;;  %v1942_v13 = vmul.f32 -4.775, %v1890_v6 }
 0x983   :  { %v1893_v9 = vpop.f32.mrb[10].mxu1 }
 0x984   :  { %v8326_v10 = vpop.f32.mrb[11].mxu1  ;;  %v1900_v11 = vsel %vm1722_vm3, %v1896_v7, 0 }
 0x985   :  { %8328 = vmatpush3.bf16.msra.mxu0 %v1900_v11 }
 0x986   :  { %8339 = vmatprep.subr.bf16.mxu0 %v9296_v17 }
 0x988   :  { %8330 = vmatmul.mubr.msk.bf16.vlgmr.msra.gmra.mrb[16].mxu0 %vm25_vm0, %v1896_v7 }
 0x989   :  { %8343 = vmatprep.mubr.msk.bf16.mxu0 %vm9295_vm1, %v9296_v17 }
 0xa5b   :  { %v1936_v12 = vpop.f32.mrb[16].mxu0 }
 0xa5c   :  { %v1943_v14 = vmul.f32 2.0315, %v1936_v12  ;;  %v8331_v15 = vpop.f32.mrb[17].mxu0 }
 0xa5d   :  { %v1939_v16 = vpop.f32.mrb[18].mxu0 }
 0xa5e   :  { %v1944_v18 = vadd.f32 %v1943_v14, %v1942_v13  ;;  %v8332_v19 = vpop.f32.mrb[19].mxu0 }
 0xa60   :  { %v1945_v20 = vpack.c.bf16 %v1944_v18, %v1944_v18 }
 0xa62   :  { %9276 = vmatprep.subr.msk.bf16.mxu1 %vm1722_vm3, %v1945_v20  ;;  %v1957_v21 = vsel %vm1722_vm3, %v1945_v20, 0 }
 0xa63   :  { %8334 = vmatpush3.bf16.msra.mxu1 %v1957_v21 }
 0xa64   :  { %8347 = vmatprep.subr.bf16.mxu1 %v9296_v17 }
 0xa66   :  { %8336 = vmatmul.mubr.msk.bf16.vlgmr.msra.gmra.mrb[12].mxu1 %vm25_vm0, %v1836_v3 }
 0xa67   :  { %8349 = vmatprep.mubr.msk.bf16.mxu1 %vm9295_vm1, %v9296_v17 }
 0xb39   :  { %v8337_v23 = vpop.f32.mrb[12].mxu1 }
 0xb3a   :  { %v2010_v25 = vadd.f32 %v8337_v23, %v1948_v22  ;;  %v1993_v26 = vpop.f32.mrb[13].mxu1 }
 0xb3b   :  { %v2008_v28 = vadd.f32 %v1993_v26, %v1946_v24  ;;  %v8338_v29 = vpop.f32.mrb[14].mxu1 }
 0xb3c   :  { %v2011_v31 = vadd.f32 %v8338_v29, %v1949_v27  ;;  %v1996_v32 = vpop.f32.mrb[15].mxu1  ;;  %v2125_v48 = vmul.f32 3.4445, %v2010_v25 }
 0xb3d   :  { %v2009_v33 = vadd.f32 %v1996_v32, %v1947_v30  ;;  %v2123_v50 = vmul.f32 3.4445, %v2008_v28 }
 0xb3e   :  { %v2013_v34 = vpack.c.bf16 %v2011_v31, %v2010_v25  ;;  %v2126_v54 = vmul.f32 3.4445, %v2011_v31 }
 0xb3f   :  { %v2012_v35 = vpack.c.bf16 %v2009_v33, %v2008_v28  ;;  %v2124_v57 = vmul.f32 3.4445, %v2009_v33 }
 0xb41   :  { %2014 = vxpose.xlu0.c.b16.start [1/2] (short) (narrow) %v2012_v35, 16  ;;  %8340 = vmatpush3.bf16.msra.mxu0 %v2012_v35 }
 0xb42   :  { %8341 = vmatprep.subr.bf16.mxu0 %v9296_v17 }
 0xb45   :  { %2015 = vxpose.xlu0.c.b16.end [2/2] (short) (narrow) %v2013_v34, 16  ;;  %8342 = vmatpush3.bf16.msra.mxu0 %v2013_v34 }
 0xba7   :  { %v2022_v36 = vpop.trf.xlu0 }
 0xba8   :  { %8344 = vmatmul.mubr.msk.bf16.vlgmr.msra.gmra.mrb[20].mxu0 %vm121_vm2, %v2022_v36 }
 0xba9   :  { %8355 = vmatprep.mubr.msk.bf16.mxu0 %vm25_vm0, %v2012_v35 }
 0xc7b   :  { %v2067_v60 = vpop.f32.mrb[20].mxu0 }
 0xc7c   :  { %v2073_v59 = vpack.c.bf16 %v2067_v60, %v2067_v60  ;;  %v8345_v62 = vpop.f32.mrb[21].mxu0  ;;  %v2119_v40 = vmul.f32 -4.775, %v2067_v60 }
 0xc7d   :  { %v2070_v61 = vpop.f32.mrb[22].mxu0 }
 0xc7e   :  { %v8346_v37 = vpop.f32.mrb[23].mxu0  ;;  %v2077_v38 = vsel %vm1722_vm3, %v2073_v59, 0 }
 0xc7f   :  { %8348 = vmatpush3.bf16.msra.mxu1 %v2077_v38 }
 0xc80   :  { %8359 = vmatprep.subr.bf16.mxu1 %v9296_v17 }
 0xc82   :  { %8350 = vmatmul.mubr.msk.bf16.vlgmr.msra.gmra.mrb[16].mxu1 %vm25_vm0, %v2073_v59 }
 0xc83   :  { %8363 = vmatprep.mubr.msk.bf16.mxu1 %vm9295_vm1, %v9296_v17 }
 0xd55   :  { %v2113_v39 = vpop.f32.mrb[16].mxu1 }
 0xd56   :  { %v2120_v41 = vmul.f32 2.0315, %v2113_v39  ;;  %v8351_v42 = vpop.f32.mrb[17].mxu1 }
 0xd57   :  { %v2116_v43 = vpop.f32.mrb[18].mxu1 }
 0xd58   :  { %v2121_v44 = vadd.f32 %v2120_v41, %v2119_v40  ;;  %v8352_v45 = vpop.f32.mrb[19].mxu1 }
 0xd5a   :  { %v2122_v46 = vpack.c.bf16 %v2121_v44, %v2121_v44 }
 0xd5c   :  { %9277 = vmatprep.subr.msk.bf16.mxu0 %vm1722_vm3, %v2122_v46  ;;  %v2134_v47 = vsel %vm1722_vm3, %v2122_v46, 0 }
 0xd5d   :  { %8354 = vmatpush3.bf16.msra.mxu0 %v2134_v47 }
 0xd5e   :  { %8367 = vmatprep.subr.bf16.mxu0 %v9296_v17 }
 0xd60   :  { %8356 = vmatmul.mubr.msk.bf16.vlgmr.msra.gmra.mrb[24].mxu0 %vm25_vm0, %v2013_v34 }
 0xd61   :  { %8369 = vmatprep.mubr.msk.bf16.mxu0 %vm9295_vm1, %v9296_v17 }
 0xe33   :  { %v8357_v49 = vpop.f32.mrb[24].mxu0 }
 0xe34   :  { %v2187_v52 = vadd.f32 %v8357_v49, %v2125_v48  ;;  %v2170_v53 = vpop.f32.mrb[25].mxu0 }
 0xe35   :  { %v2185_v55 = vadd.f32 %v2170_v53, %v2123_v50  ;;  %v8358_v56 = vpop.f32.mrb[26].mxu0 }
 0xe36   :  { %v2188_v58 = vadd.f32 %v8358_v56, %v2126_v54  ;;  %v2173_v63 = vpop.f32.mrb[27].mxu0  ;;  %v2302_v20 = vmul.f32 3.4445, %v2187_v52 }
 0xe37   :  { %v2186_v0 = vadd.f32 %v2173_v63, %v2124_v57  ;;  %v2300_v22 = vmul.f32 3.4445, %v2185_v55 }
 0xe38   :  { %v2190_v1 = vpack.c.bf16 %v2188_v58, %v2187_v52  ;;  %v2303_v25 = vmul.f32 3.4445, %v2188_v58 }
 0xe39   :  { %v2189_v2 = vpack.c.bf16 %v2186_v0, %v2185_v55  ;;  %v2301_v28 = vmul.f32 3.4445, %v2186_v0 }
 0xe3b   :  { %2191 = vxpose.xlu1.c.b16.start [1/2] (short) (narrow) %v2189_v2, 16  ;;  %8360 = vmatpush3.bf16.msra.mxu1 %v2189_v2 }
 0xe3c   :  { %8361 = vmatprep.subr.bf16.mxu1 %v9296_v17 }
 0xe3f   :  { %2192 = vxpose.xlu1.c.b16.end [2/2] (short) (narrow) %v2190_v1, 16  ;;  %8362 = vmatpush3.bf16.msra.mxu1 %v2190_v1 }
 0xea1   :  { %v2199_v3 = vpop.trf.xlu1 }
 0xea2   :  { %8364 = vmatmul.mubr.msk.bf16.vlgmr.msra.gmra.mrb[20].mxu1 %vm121_vm2, %v2199_v3 }
 0xea3   :  { %8375 = vmatprep.mubr.msk.bf16.mxu1 %vm25_vm0, %v2189_v2 }
 0xf75   :  { %v2244_v4 = vpop.f32.mrb[20].mxu1 }
 0xf76   :  { %v2250_v5 = vpack.c.bf16 %v2244_v4, %v2244_v4  ;;  %v8365_v6 = vpop.f32.mrb[21].mxu1  ;;  %v2296_v11 = vmul.f32 -4.775, %v2244_v4 }
 0xf77   :  { %v2247_v7 = vpop.f32.mrb[22].mxu1 }
 0xf78   :  { %v8366_v8 = vpop.f32.mrb[23].mxu1  ;;  %v2254_v9 = vsel %vm1722_vm3, %v2250_v5, 0 }
 0xf79   :  { %8368 = vmatpush3.bf16.msra.mxu0 %v2254_v9 }
 0xf7a   :  { %8379 = vmatprep.subr.bf16.mxu0 %v9296_v17 }
 0xf7c   :  { %8370 = vmatmul.mubr.msk.bf16.vlgmr.msra.gmra.mrb[28].mxu0 %vm25_vm0, %v2250_v5 }
 0xf7d   :  { %8383 = vmatprep.mubr.msk.bf16.mxu0 %vm9295_vm1, %v9296_v17 }
0x104f   :  { %v2290_v10 = vpop.f32.mrb[28].mxu0 }
0x1050   :  { %v2297_v12 = vmul.f32 2.0315, %v2290_v10  ;;  %v8371_v13 = vpop.f32.mrb[29].mxu0 }
0x1051   :  { %v2293_v14 = vpop.f32.mrb[30].mxu0 }
0x1052   :  { %v2298_v15 = vadd.f32 %v2297_v12, %v2296_v11  ;;  %v8372_v16 = vpop.f32.mrb[31].mxu0 }
0x1054   :  { %v2299_v18 = vpack.c.bf16 %v2298_v15, %v2298_v15 }
0x1056   :  { %9278 = vmatprep.subr.msk.bf16.mxu1 %vm1722_vm3, %v2299_v18  ;;  %v2311_v19 = vsel %vm1722_vm3, %v2299_v18, 0 }
0x1057   :  { %8374 = vmatpush3.bf16.msra.mxu1 %v2311_v19 }
0x1058   :  { %8387 = vmatprep.subr.bf16.mxu1 %v9296_v17 }
0x105a   :  { %8376 = vmatmul.mubr.msk.bf16.vlgmr.msra.gmra.mrb[24].mxu1 %vm25_vm0, %v2190_v1 }
0x105b   :  { %8389 = vmatprep.mubr.msk.bf16.mxu1 %vm9295_vm1, %v9296_v17 }
0x112d   :  { %v8377_v21 = vpop.f32.mrb[24].mxu1 }
0x112e   :  { %v2364_v23 = vadd.f32 %v8377_v21, %v2302_v20  ;;  %v2347_v24 = vpop.f32.mrb[25].mxu1 }
0x112f   :  { %v2362_v26 = vadd.f32 %v2347_v24, %v2300_v22  ;;  %v8378_v27 = vpop.f32.mrb[26].mxu1 }
0x1130   :  { %v2365_v29 = vadd.f32 %v8378_v27, %v2303_v25  ;;  %v2350_v30 = vpop.f32.mrb[27].mxu1  ;;  %v2479_v46 = vmul.f32 3.4445, %v2364_v23 }
0x1131   :  { %v2363_v31 = vadd.f32 %v2350_v30, %v2301_v28  ;;  %v2477_v48 = vmul.f32 3.4445, %v2362_v26 }
0x1132   :  { %v2367_v32 = vpack.c.bf16 %v2365_v29, %v2364_v23  ;;  %v2480_v52 = vmul.f32 3.4445, %v2365_v29 }
0x1133   :  { %v2366_v33 = vpack.c.bf16 %v2363_v31, %v2362_v26  ;;  %v2478_v55 = vmul.f32 3.4445, %v2363_v31 }
0x1135   :  { %2368 = vxpose.xlu0.c.b16.start [1/2] (short) (narrow) %v2366_v33, 16  ;;  %8380 = vmatpush3.bf16.msra.mxu0 %v2366_v33 }
0x1136   :  { %8381 = vmatprep.subr.bf16.mxu0 %v9296_v17 }
0x1139   :  { %2369 = vxpose.xlu0.c.b16.end [2/2] (short) (narrow) %v2367_v32, 16  ;;  %8382 = vmatpush3.bf16.msra.mxu0 %v2367_v32 }
0x119b   :  { %v2376_v34 = vpop.trf.xlu0 }
0x119c   :  { %8384 = vmatmul.mubr.msk.bf16.vlgmr.msra.gmra.mrb[32].mxu0 %vm121_vm2, %v2376_v34 }
0x119d   :  { %8395 = vmatprep.mubr.msk.bf16.mxu0 %vm25_vm0, %v2366_v33 }
0x126f   :  { %v2421_v35 = vpop.f32.mrb[32].mxu0 }
0x1270   :  { %v2427_v36 = vpack.c.bf16 %v2421_v35, %v2421_v35  ;;  %v8385_v60 = vpop.f32.mrb[33].mxu0  ;;  %v2473_v38 = vmul.f32 -4.775, %v2421_v35 }
0x1271   :  { %v2424_v59 = vpop.f32.mrb[34].mxu0 }
0x1272   :  { %v8386_v62 = vpop.f32.mrb[35].mxu0  ;;  %v2431_v61 = vsel %vm1722_vm3, %v2427_v36, 0 }
0x1273   :  { %8388 = vmatpush3.bf16.msra.mxu1 %v2431_v61 }
0x1274   :  { %8399 = vmatprep.subr.bf16.mxu1 %v9296_v17 }
0x1276   :  { %8390 = vmatmul.mubr.msk.bf16.vlgmr.msra.gmra.mrb[28].mxu1 %vm25_vm0, %v2427_v36 }
0x1277   :  { %8403 = vmatprep.mubr.msk.bf16.mxu1 %vm9295_vm1, %v9296_v17 }
0x1349   :  { %v2467_v37 = vpop.f32.mrb[28].mxu1 }
0x134a   :  { %v2474_v39 = vmul.f32 2.0315, %v2467_v37  ;;  %v8391_v40 = vpop.f32.mrb[29].mxu1 }
0x134b   :  { %v2470_v41 = vpop.f32.mrb[30].mxu1 }
0x134c   :  { %v2475_v42 = vadd.f32 %v2474_v39, %v2473_v38  ;;  %v8392_v43 = vpop.f32.mrb[31].mxu1 }
0x134e   :  { %v2476_v44 = vpack.c.bf16 %v2475_v42, %v2475_v42 }
0x1350   :  { %9279 = vmatprep.subr.msk.bf16.mxu0 %vm1722_vm3, %v2476_v44  ;;  %v2488_v45 = vsel %vm1722_vm3, %v2476_v44, 0 }
0x1351   :  { %8394 = vmatpush3.bf16.msra.mxu0 %v2488_v45 }
0x1352   :  { %8407 = vmatprep.subr.bf16.mxu0 %v9296_v17 }
0x1354   :  { %8396 = vmatmul.mubr.msk.bf16.vlgmr.msra.gmra.mrb[36].mxu0 %vm25_vm0, %v2367_v32 }
0x1355   :  { %8409 = vmatprep.mubr.msk.bf16.mxu0 %vm9295_vm1, %v9296_v17 }
0x1427   :  { %v8397_v47 = vpop.f32.mrb[36].mxu0 }
0x1428   :  { %v2541_v49 = vadd.f32 %v8397_v47, %v2479_v46  ;;  %v2524_v50 = vpop.f32.mrb[37].mxu0 }
0x1429   :  { %v2539_v53 = vadd.f32 %v2524_v50, %v2477_v48  ;;  %v8398_v54 = vpop.f32.mrb[38].mxu0 }
0x142a   :  { %v2542_v56 = vadd.f32 %v8398_v54, %v2480_v52  ;;  %v2527_v57 = vpop.f32.mrb[39].mxu0  ;;  %v2656_v18 = vmul.f32 3.4445, %v2541_v49 }
0x142b   :  { %v2540_v58 = vadd.f32 %v2527_v57, %v2478_v55  ;;  %v2654_v20 = vmul.f32 3.4445, %v2539_v53 }
0x142c   :  { %v2544_v63 = vpack.c.bf16 %v2542_v56, %v2541_v49  ;;  %v2657_v23 = vmul.f32 3.4445, %v2542_v56 }
0x142d   :  { %v2543_v0 = vpack.c.bf16 %v2540_v58, %v2539_v53  ;;  %v2655_v26 = vmul.f32 3.4445, %v2540_v58 }
0x142f   :  { %2545 = vxpose.xlu0.c.b16.start [1/2] (short) (narrow) %v2543_v0, 16  ;;  %8400 = vmatpush3.bf16.msra.mxu1 %v2543_v0 }
0x1430   :  { %8401 = vmatprep.subr.bf16.mxu1 %v9296_v17 }
0x1433   :  { %2546 = vxpose.xlu0.c.b16.end [2/2] (short) (narrow) %v2544_v63, 16  ;;  %8402 = vmatpush3.bf16.msra.mxu1 %v2544_v63 }
0x1495   :  { %v2553_v1 = vpop.trf.xlu0 }
0x1496   :  { %8404 = vmatmul.mubr.msk.bf16.vlgmr.msra.gmra.mrb[32].mxu1 %vm121_vm2, %v2553_v1 }
0x1497   :  { %8415 = vmatprep.mubr.msk.bf16.mxu1 %vm25_vm0, %v2543_v0 }
0x1569   :  { %v2598_v2 = vpop.f32.mrb[32].mxu1 }
0x156a   :  { %v2604_v3 = vpack.c.bf16 %v2598_v2, %v2598_v2  ;;  %v8405_v4 = vpop.f32.mrb[33].mxu1  ;;  %v2650_v9 = vmul.f32 -4.775, %v2598_v2 }
0x156b   :  { %v2601_v5 = vpop.f32.mrb[34].mxu1 }
0x156c   :  { %v8406_v6 = vpop.f32.mrb[35].mxu1  ;;  %v2608_v7 = vsel %vm1722_vm3, %v2604_v3, 0 }
0x156d   :  { %8408 = vmatpush3.bf16.msra.mxu0 %v2608_v7 }
0x156e   :  { %8419 = vmatprep.subr.bf16.mxu0 %v9296_v17 }
0x1570   :  { %8410 = vmatmul.mubr.msk.bf16.vlgmr.msra.gmra.mrb[40].mxu0 %vm25_vm0, %v2604_v3 }
0x1571   :  { %8423 = vmatprep.mubr.msk.bf16.mxu0 %vm9295_vm1, %v9296_v17 }
0x1643   :  { %v2644_v8 = vpop.f32.mrb[40].mxu0 }
0x1644   :  { %v2651_v10 = vmul.f32 2.0315, %v2644_v8  ;;  %v8411_v11 = vpop.f32.mrb[41].mxu0 }
0x1645   :  { %v2647_v12 = vpop.f32.mrb[42].mxu0 }
0x1646   :  { %v2652_v13 = vadd.f32 %v2651_v10, %v2650_v9  ;;  %v8412_v14 = vpop.f32.mrb[43].mxu0 }
0x1648   :  { %v2653_v15 = vpack.c.bf16 %v2652_v13, %v2652_v13 }
0x164a   :  { %9280 = vmatprep.subr.msk.bf16.mxu1 %vm1722_vm3, %v2653_v15  ;;  %v2665_v16 = vsel %vm1722_vm3, %v2653_v15, 0 }
0x164b   :  { %8414 = vmatpush3.bf16.msra.mxu1 %v2665_v16 }
0x164c   :  { %8427 = vmatprep.subr.bf16.mxu1 %v9296_v17 }
0x164e   :  { %8416 = vmatmul.mubr.msk.bf16.vlgmr.msra.gmra.mrb[36].mxu1 %vm25_vm0, %v2544_v63 }
0x164f   :  { %8429 = vmatprep.mubr.msk.bf16.mxu1 %vm9295_vm1, %v9296_v17 }
0x1721   :  { %v8417_v19 = vpop.f32.mrb[36].mxu1 }
0x1722   :  { %v2718_v21 = vadd.f32 %v8417_v19, %v2656_v18  ;;  %v2701_v22 = vpop.f32.mrb[37].mxu1 }
0x1723   :  { %v2716_v24 = vadd.f32 %v2701_v22, %v2654_v20  ;;  %v8418_v25 = vpop.f32.mrb[38].mxu1 }
0x1724   :  { %v2719_v27 = vadd.f32 %v8418_v25, %v2657_v23  ;;  %v2704_v28 = vpop.f32.mrb[39].mxu1  ;;  %v2833_v44 = vmul.f32 3.4445, %v2718_v21 }
0x1725   :  { %v2717_v29 = vadd.f32 %v2704_v28, %v2655_v26  ;;  %v2831_v46 = vmul.f32 3.4445, %v2716_v24 }
0x1726   :  { %v2721_v30 = vpack.c.bf16 %v2719_v27, %v2718_v21  ;;  %v2834_v49 = vmul.f32 3.4445, %v2719_v27 }
0x1727   :  { %v2720_v31 = vpack.c.bf16 %v2717_v29, %v2716_v24  ;;  %v2832_v53 = vmul.f32 3.4445, %v2717_v29 }
0x1729   :  { %2722 = vxpose.xlu0.c.b16.start [1/2] (short) (narrow) %v2720_v31, 16  ;;  %8420 = vmatpush3.bf16.msra.mxu0 %v2720_v31 }
0x172a   :  { %8421 = vmatprep.subr.bf16.mxu0 %v9296_v17 }
0x172d   :  { %2723 = vxpose.xlu0.c.b16.end [2/2] (short) (narrow) %v2721_v30, 16  ;;  %8422 = vmatpush3.bf16.msra.mxu0 %v2721_v30 }
0x178f   :  { %v2730_v32 = vpop.trf.xlu0 }
0x1790   :  { %8424 = vmatmul.mubr.msk.bf16.vlgmr.msra.gmra.mrb[44].mxu0 %vm121_vm2, %v2730_v32 }
0x1791   :  { %8435 = vmatprep.mubr.msk.bf16.mxu0 %vm25_vm0, %v2720_v31 }
0x1863   :  { %v2775_v33 = vpop.f32.mrb[44].mxu0 }
0x1864   :  { %v2781_v34 = vpack.c.bf16 %v2775_v33, %v2775_v33  ;;  %v8425_v35 = vpop.f32.mrb[45].mxu0  ;;  %v2827_v61 = vmul.f32 -4.775, %v2775_v33 }
0x1865   :  { %v2778_v36 = vpop.f32.mrb[46].mxu0 }
0x1866   :  { %v8426_v60 = vpop.f32.mrb[47].mxu0  ;;  %v2785_v59 = vsel %vm1722_vm3, %v2781_v34, 0 }
0x1867   :  { %8428 = vmatpush3.bf16.msra.mxu1 %v2785_v59 }
0x1868   :  { %8439 = vmatprep.subr.bf16.mxu1 %v9296_v17 }
0x186a   :  { %8430 = vmatmul.mubr.msk.bf16.vlgmr.msra.gmra.mrb[40].mxu1 %vm25_vm0, %v2781_v34 }
0x186b   :  { %8443 = vmatprep.mubr.msk.bf16.mxu1 %vm9295_vm1, %v9296_v17 }
0x193d   :  { %v2821_v62 = vpop.f32.mrb[40].mxu1 }
0x193e   :  { %v2828_v37 = vmul.f32 2.0315, %v2821_v62  ;;  %v8431_v38 = vpop.f32.mrb[41].mxu1 }
0x193f   :  { %v2824_v39 = vpop.f32.mrb[42].mxu1 }
0x1940   :  { %v2829_v40 = vadd.f32 %v2828_v37, %v2827_v61  ;;  %v8432_v41 = vpop.f32.mrb[43].mxu1 }
0x1942   :  { %v2830_v42 = vpack.c.bf16 %v2829_v40, %v2829_v40 }
0x1944   :  { %9281 = vmatprep.subr.msk.bf16.mxu0 %vm1722_vm3, %v2830_v42  ;;  %v2842_v43 = vsel %vm1722_vm3, %v2830_v42, 0 }
0x1945   :  { %8434 = vmatpush3.bf16.msra.mxu0 %v2842_v43 }
0x1946   :  { %8447 = vmatprep.subr.bf16.mxu0 %v9296_v17 }
0x1948   :  { %8436 = vmatmul.mubr.msk.bf16.vlgmr.msra.gmra.mrb[48].mxu0 %vm25_vm0, %v2721_v30 }
0x1949   :  { %8449 = vmatprep.mubr.msk.bf16.mxu0 %vm9295_vm1, %v9296_v17 }
0x1a1b   :  { %v8437_v45 = vpop.f32.mrb[48].mxu0 }
0x1a1c   :  { %v2895_v47 = vadd.f32 %v8437_v45, %v2833_v44  ;;  %v2878_v48 = vpop.f32.mrb[49].mxu0 }
0x1a1d   :  { %v2893_v50 = vadd.f32 %v2878_v48, %v2831_v46  ;;  %v8438_v52 = vpop.f32.mrb[50].mxu0 }
0x1a1e   :  { %v2896_v54 = vadd.f32 %v8438_v52, %v2834_v49  ;;  %v2881_v55 = vpop.f32.mrb[51].mxu0  ;;  %v3010_v15 = vmul.f32 3.4445, %v2895_v47 }
0x1a1f   :  { %v2894_v56 = vadd.f32 %v2881_v55, %v2832_v53  ;;  %v3008_v18 = vmul.f32 3.4445, %v2893_v50 }
0x1a20   :  { %v2898_v57 = vpack.c.bf16 %v2896_v54, %v2895_v47  ;;  %v3011_v21 = vmul.f32 3.4445, %v2896_v54 }
0x1a21   :  { %v2897_v58 = vpack.c.bf16 %v2894_v56, %v2893_v50  ;;  %v3009_v24 = vmul.f32 3.4445, %v2894_v56 }
0x1a23   :  { %2899 = vxpose.xlu0.c.b16.start [1/2] (short) (narrow) %v2897_v58, 16  ;;  %8440 = vmatpush3.bf16.msra.mxu1 %v2897_v58 }
0x1a24   :  { %8441 = vmatprep.subr.bf16.mxu1 %v9296_v17 }
0x1a27   :  { %2900 = vxpose.xlu0.c.b16.end [2/2] (short) (narrow) %v2898_v57, 16  ;;  %8442 = vmatpush3.bf16.msra.mxu1 %v2898_v57 }
0x1a89   :  { %v2907_v63 = vpop.trf.xlu0 }
0x1a8a   :  { %8444 = vmatmul.mubr.msk.bf16.vlgmr.msra.gmra.mrb[44].mxu1 %vm121_vm2, %v2907_v63 }
0x1a8b   :  { %8455 = vmatprep.mubr.msk.bf16.mxu1 %vm25_vm0, %v2897_v58 }
0x1b5d   :  { %v2952_v0 = vpop.f32.mrb[44].mxu1 }
0x1b5e   :  { %v2958_v1 = vpack.c.bf16 %v2952_v0, %v2952_v0  ;;  %v8445_v2 = vpop.f32.mrb[45].mxu1  ;;  %v3004_v7 = vmul.f32 -4.775, %v2952_v0 }
0x1b5f   :  { %v2955_v3 = vpop.f32.mrb[46].mxu1 }
0x1b60   :  { %v8446_v4 = vpop.f32.mrb[47].mxu1  ;;  %v2962_v5 = vsel %vm1722_vm3, %v2958_v1, 0 }
0x1b61   :  { %8448 = vmatpush3.bf16.msra.mxu0 %v2962_v5 }
0x1b62   :  { %8459 = vmatprep.subr.bf16.mxu0 %v9296_v17 }
0x1b64   :  { %8450 = vmatmul.mubr.msk.bf16.vlgmr.msra.gmra.mrb[52].mxu0 %vm25_vm0, %v2958_v1 }
0x1b65   :  { %8463 = vmatprep.mubr.msk.bf16.mxu0 %vm9295_vm1, %v9296_v17 }
0x1c37   :  { %v2998_v6 = vpop.f32.mrb[52].mxu0 }
0x1c38   :  { %v3005_v8 = vmul.f32 2.0315, %v2998_v6  ;;  %v8451_v9 = vpop.f32.mrb[53].mxu0 }
0x1c39   :  { %v3001_v10 = vpop.f32.mrb[54].mxu0 }
0x1c3a   :  { %v3006_v11 = vadd.f32 %v3005_v8, %v3004_v7  ;;  %v8452_v12 = vpop.f32.mrb[55].mxu0 }
0x1c3c   :  { %v3007_v13 = vpack.c.bf16 %v3006_v11, %v3006_v11 }
0x1c3e   :  { %9282 = vmatprep.subr.msk.bf16.mxu1 %vm1722_vm3, %v3007_v13  ;;  %v3019_v14 = vsel %vm1722_vm3, %v3007_v13, 0 }
0x1c3f   :  { %8454 = vmatpush3.bf16.msra.mxu1 %v3019_v14 }
0x1c40   :  { %8467 = vmatprep.subr.bf16.mxu1 %v9296_v17 }
0x1c42   :  { %8456 = vmatmul.mubr.msk.bf16.vlgmr.msra.gmra.mrb[48].mxu1 %vm25_vm0, %v2898_v57 }
0x1c43   :  { %8469 = vmatprep.mubr.msk.bf16.mxu1 %vm9295_vm1, %v9296_v17 }
0x1d15   :  { %v8457_v16 = vpop.f32.mrb[48].mxu1 }
0x1d16   :  { %v3072_v19 = vadd.f32 %v8457_v16, %v3010_v15  ;;  %v3055_v20 = vpop.f32.mrb[49].mxu1 }
0x1d17   :  { %v3070_v22 = vadd.f32 %v3055_v20, %v3008_v18  ;;  %v8458_v23 = vpop.f32.mrb[50].mxu1 }
0x1d18   :  { %v3073_v25 = vadd.f32 %v8458_v23, %v3011_v21  ;;  %v3058_v26 = vpop.f32.mrb[51].mxu1  ;;  %v3187_v42 = vmul.f32 3.4445, %v3072_v19 }
0x1d19   :  { %v3071_v27 = vadd.f32 %v3058_v26, %v3009_v24  ;;  %v3185_v44 = vmul.f32 3.4445, %v3070_v22 }
0x1d1a   :  { %v3075_v28 = vpack.c.bf16 %v3073_v25, %v3072_v19  ;;  %v3188_v47 = vmul.f32 3.4445, %v3073_v25 }
0x1d1b   :  { %v3074_v29 = vpack.c.bf16 %v3071_v27, %v3070_v22  ;;  %v3186_v50 = vmul.f32 3.4445, %v3071_v27 }
0x1d1d   :  { %3076 = vxpose.xlu1.c.b16.start [1/2] (short) (narrow) %v3074_v29, 16  ;;  %8460 = vmatpush3.bf16.msra.mxu0 %v3074_v29 }
0x1d1e   :  { %8461 = vmatprep.subr.bf16.mxu0 %v9296_v17 }
0x1d21   :  { %3077 = vxpose.xlu1.c.b16.end [2/2] (short) (narrow) %v3075_v28, 16  ;;  %8462 = vmatpush3.bf16.msra.mxu0 %v3075_v28 }
0x1d83   :  { %v3084_v30 = vpop.trf.xlu1 }
0x1d84   :  { %8464 = vmatmul.mubr.msk.bf16.vlgmr.msra.gmra.mrb[56].mxu0 %vm121_vm2, %v3084_v30 }
0x1d85   :  { %8475 = vmatprep.mubr.msk.bf16.mxu0 %vm25_vm0, %v3074_v29 }
0x1e57   :  { %v3129_v31 = vpop.f32.mrb[56].mxu0 }
0x1e58   :  { %v3135_v32 = vpack.c.bf16 %v3129_v31, %v3129_v31  ;;  %v8465_v33 = vpop.f32.mrb[57].mxu0  ;;  %v3181_v59 = vmul.f32 -4.775, %v3129_v31 }
0x1e59   :  { %v3132_v34 = vpop.f32.mrb[58].mxu0 }
0x1e5a   :  { %v8466_v35 = vpop.f32.mrb[59].mxu0  ;;  %v3139_v36 = vsel %vm1722_vm3, %v3135_v32, 0 }
0x1e5b   :  { %8468 = vmatpush3.bf16.msra.mxu1 %v3139_v36 }
0x1e5c   :  { %8971 = vmatprep.subr.bf16.mxu1 %v9294_v51 }
0x1e5e   :  { %8470 = vmatmul.mubr.msk.bf16.vlgmr.msra.gmra.mrb[52].mxu1 %vm25_vm0, %v3135_v32 }
0x1e5f   :  { %8487 = vmatprep.mubr.msk.f32.mxu1 %vm9295_vm1, %v9296_v17 }
0x1f31   :  { %v3175_v60 = vpop.f32.mrb[52].mxu1 }
0x1f32   :  { %v3182_v62 = vmul.f32 2.0315, %v3175_v60  ;;  %v8471_v61 = vpop.f32.mrb[53].mxu1 }
0x1f33   :  { %v3178_v37 = vpop.f32.mrb[54].mxu1 }
0x1f34   :  { %v3183_v38 = vadd.f32 %v3182_v62, %v3181_v59  ;;  %v8472_v39 = vpop.f32.mrb[55].mxu1 }
0x1f36   :  { %v3184_v40 = vpack.c.bf16 %v3183_v38, %v3183_v38 }
0x1f38   :  { %9283 = vmatprep.subr.msk.bf16.mxu0 %vm1722_vm3, %v3184_v40  ;;  %v3196_v41 = vsel %vm1722_vm3, %v3184_v40, 0 }
0x1f39   :  { %8474 = vmatpush3.bf16.msra.mxu0 %v3196_v41 }
0x1f3c   :  { %8476 = vmatmul.mubr.msk.bf16.vlgmr.msra.gmra.mrb[60].mxu0 %vm25_vm0, %v3075_v28 }
0x200f   :  { %v8477_v43 = vpop.f32.mrb[60].mxu0 }
0x2010   :  { %v9568_v45 = vadd.f32 %v8477_v43, %v3187_v42  ;;  %v3232_v46 = vpop.f32.mrb[61].mxu0 }
0x2011   :  { %v9570_v48 = vadd.f32 %v3232_v46, %v3185_v44  ;;  %v8478_v49 = vpop.f32.mrb[62].mxu0 }
0x2012   :  { %v9572_v52 = vadd.f32 %v8478_v49, %v3188_v47  ;;  %v3235_v53 = vpop.f32.mrb[63].mxu0  ;;  %v3293_v54 = vand.u32 4294901760, %v9568_v45  ;;  %v3782_v59 = vsel %vm25_vm0, %v9568_v45, 0 }
0x2013   :  { %v9575_v55 = vadd.f32 %v3235_v53, %v3186_v50  ;;  %3251 = vxpose.xlu0.b32.start [1/4] (short) (narrow) %v9570_v48, 8  ;;  %v9580_v56 = vsel %vm25_vm0, %v9570_v48, 0  ;;  %v3287_v57 = vand.u32 4294901760, %v9570_v48  ;;  %v3873_v61 = vand.u32 4294901760, %v3782_v59 }
0x2014   :  { %v9584_v58 = vand.u32 4294901760, %v9580_v56  ;;  %v3296_v63 = vand.u32 4294901760, %v9572_v52  ;;  %v3381_v0 = vsub.f32 %v9568_v45, %v3293_v54  ;;  %v3785_v37 = vsel %vm25_vm0, %v9572_v52, 0 }
0x2015   :  { %v3290_v1 = vand.u32 4294901760, %v9575_v55  ;;  %v3367_v2 = vsub.f32 %v9570_v48, %v3287_v57  ;;  %v3779_v60 = vsel %vm25_vm0, %v9575_v55, 0  ;;  %v3883_v39 = vand.u32 4294901760, %v3785_v37 }
0x2016   :  { %8555 = vmatprep.mubr.f32.mxu0 %v9584_v58  ;;  %v9591_v3 = vpack.c.bf16 %v3296_v63, %v3293_v54  ;;  %v3388_v4 = vsub.f32 %v9572_v52, %v3296_v63  ;;  %v3382_v5 = vand.u32 4294901760, %v3381_v0  ;;  %v3854_v33 = vsub.f32 %v9580_v56, %v9584_v58 }
0x2017   :  { %3252 = vxpose.xlu0.b32.cont [2/4] (short) (narrow) %v9575_v55, 8  ;;  %v8972_v6 = vpack.c.bf16 %v3290_v1, %v3287_v57  ;;  %v3374_v7 = vsub.f32 %v9575_v55, %v3290_v1  ;;  %v3368_v8 = vand.u32 4294901760, %v3367_v2  ;;  %v3863_v62 = vand.u32 4294901760, %v3779_v60 }
0x2018   :  { %v3383_v9 = vsub.f32 %v3381_v0, %v3382_v5  ;;  %v3389_v10 = vand.u32 4294901760, %v3388_v4  ;;  %v8987_v11 = vpack.c.bf16 %v3388_v4, %v3381_v0  ;;  %v3855_v34 = vand.u32 4294901760, %v3854_v33 }
0x2019   :  { %8973 = vmatpush3.bf16.msra.mxu1 %v8972_v6  ;;  %v3369_v12 = vsub.f32 %v3367_v2, %v3368_v8  ;;  %v3375_v13 = vand.u32 4294901760, %v3374_v7  ;;  %v8984_v14 = vpack.c.bf16 %v3374_v7, %v3367_v2  ;;  %v3864_v38 = vsub.f32 %v3779_v60, %v3863_v62 }
0x201a   :  { %8974 = vmatprep.subr.bf16.mxu1 %v9294_v51  ;;  %v3390_v15 = vsub.f32 %v3388_v4, %v3389_v10  ;;  %v8999_v16 = vpack.c.bf16 %v3389_v10, %v3382_v5  ;;  %v3384_v20 = vand.u32 4294901760, %v3383_v9  ;;  %v3856_v35 = vsub.f32 %v3854_v33, %v3855_v34 }
0x201b   :  { %3253 = vxpose.xlu0.b32.cont [3/4] (short) (narrow) %v9568_v45, 8  ;;  %v3376_v18 = vsub.f32 %v3374_v7, %v3375_v13  ;;  %v8996_v19 = vpack.c.bf16 %v3375_v13, %v3368_v8  ;;  %v3370_v22 = vand.u32 4294901760, %v3369_v12  ;;  %v3874_v40 = vsub.f32 %v3782_v59, %v3873_v61 }
0x201c   :  { %v3391_v21 = vand.u32 4294901760, %v3390_v15  ;;  %v3857_v36 = vand.u32 4294901760, %v3856_v35  ;;  %v3865_v41 = vand.u32 4294901760, %v3864_v38  ;;  %v3884_v42 = vsub.f32 %v3785_v37, %v3883_v39 }
0x201d   :  { %8976 = vmatpush3.bf16.msra.mxu1 %v9591_v3  ;;  %v3377_v23 = vand.u32 4294901760, %v3376_v18  ;;  %v3875_v43 = vand.u32 4294901760, %v3874_v40  ;;  %v3772_v12 = vmul.f32 1.5, %v9575_v55 }
0x201e   :  { %8977 = vmatprep.subr.bf16.mxu1 %v9294_v51  ;;  %v8981_v24 = vpack.c.bf16 %v3391_v21, %v3384_v20  ;;  %v3866_v44 = vsub.f32 %v3864_v38, %v3865_v41  ;;  %v3885_v46 = vand.u32 4294901760, %v3884_v42 }
0x201f   :  { %3254 = vxpose.xlu0.b32.end [4/4] (short) (narrow) %v9572_v52, 8  ;;  %v8978_v25 = vpack.c.bf16 %v3377_v23, %v3370_v22  ;;  %v3876_v49 = vsub.f32 %v3874_v40, %v3875_v43  ;;  %v3774_v22 = vmul.f32 1.5, %v9572_v52 }
0x2020   :  { %v3867_v56 = vand.u32 4294901760, %v3866_v44  ;;  %v3886_v57 = vsub.f32 %v3884_v42, %v3885_v46 }
0x2021   :  { %v3877_v63 = vand.u32 4294901760, %v3876_v49 }
0x2022   :  { %v3887_v1 = vand.u32 4294901760, %v3886_v57 }
0x2093   :  { %v3267_v26 = vpop.trf.xlu0 }
0x2094   :  { %v3284_v27 = vsel %vm121_vm2, %v3267_v26, 0 }
0x2095   :  { %v3355_v28 = vand.u32 4294901760, %v3284_v27 }
0x2097   :  { %v3356_v29 = vsub.f32 %v3284_v27, %v3355_v28 }
0x2099   :  { %v3357_v30 = vand.u32 4294901760, %v3356_v29 }
0x209b   :  { %v3358_v31 = vsub.f32 %v3356_v29, %v3357_v30 }
0x209d   :  { %v3359_v32 = vand.u32 4294901760, %v3358_v31 }
0x209f   :  { %8488 = vmatmul.mubr.f32.vlgmr.msra.gmra.mrb[6].mxu1 %v3359_v32 }
0x20a0   :  { %8979 = vmatpush3.bf16.msra.mxu1 %v8978_v25  ;;  %8498 = vmatprep.mubr.msk.f32.mxu1 %vm9295_vm1, %v9296_v17  ;;  %v3773_v25 = vmul.f32 1.5, %v9568_v45 }
0x20a1   :  { %8980 = vmatprep.subr.bf16.mxu1 %v9294_v51 }
0x20a4   :  { %8982 = vmatpush3.bf16.msra.mxu1 %v8981_v24 }
0x20a5   :  { %8983 = vmatprep.subr.bf16.mxu1 %v9294_v51 }
0x20a7   :  { %8499 = vmatmul.mubr.f32.vlgmr.msra.gmra.mrb[6].mxu1 %v3355_v28 }
0x20a8   :  { %8985 = vmatpush3.bf16.msra.mxu1 %v8984_v14  ;;  %8509 = vmatprep.mubr.msk.f32.mxu1 %vm9295_vm1, %v9296_v17  ;;  %v3771_v14 = vmul.f32 1.5, %v9570_v48 }
0x20a9   :  { %8986 = vmatprep.subr.bf16.mxu1 %v9294_v51 }
0x20ac   :  { %8988 = vmatpush3.bf16.msra.mxu1 %v8987_v11 }
0x20ad   :  { %8989 = vmatprep.subr.bf16.mxu1 %v9294_v51 }
0x20af   :  { %8510 = vmatmul.mubr.f32.vlgmr.msra.gmra.mrb[6].mxu1 %v3356_v29 }
0x20b0   :  { %8991 = vmatpush3.bf16.msra.mxu1 %v8972_v6  ;;  %8520 = vmatprep.mubr.msk.f32.mxu1 %vm9295_vm1, %v9296_v17 }
0x20b1   :  { %8992 = vmatprep.subr.bf16.mxu1 %v9294_v51 }
0x20b4   :  { %8994 = vmatpush3.bf16.msra.mxu1 %v9591_v3 }
0x20b5   :  { %8995 = vmatprep.subr.bf16.mxu1 %v9294_v51 }
0x20b7   :  { %8521 = vmatmul.mubr.f32.vlgmr.msra.gmra.mrb[6].mxu1 %v3357_v30 }
0x20b8   :  { %8997 = vmatpush3.bf16.msra.mxu1 %v8996_v19  ;;  %8531 = vmatprep.mubr.msk.f32.mxu1 %vm9295_vm1, %v9296_v17 }
0x20b9   :  { %8998 = vmatprep.subr.bf16.mxu1 %v9294_v51 }
0x20bc   :  { %9000 = vmatpush3.bf16.msra.mxu1 %v8999_v16 }
0x20bd   :  { %9001 = vmatprep.subr.bf16.mxu1 %v9294_v51 }
0x20bf   :  { %8532 = vmatmul.mubr.f32.vlgmr.msra.gmra.mrb[6].mxu1 %v3355_v28 }
0x20c0   :  { %9003 = vmatpush3.bf16.msra.mxu1 %v8972_v6  ;;  %8542 = vmatprep.mubr.msk.f32.mxu1 %vm9295_vm1, %v9296_v17 }
0x20c1   :  { %9004 = vmatprep.subr.bf16.mxu1 %v9294_v51 }
0x20c4   :  { %9006 = vmatpush3.bf16.msra.mxu1 %v9591_v3 }
0x20c7   :  { %8543 = vmatmul.mubr.f32.vlgmr.msra.gmra.mrb[6].mxu1 %v3355_v28 }
0x20c8   :  { %8547 = vmatprep.mubr.f32.mxu1 %v3857_v36 }
0x219a   :  { %v3767_v47 = vpop.f32.mrb[6].mxu1 }
0x219b   :  { %v3788_v50 = vand.u32 4294901760, %v3767_v47  ;;  %v8544_v53 = vpop.f32.mrb[7].mxu1 }
0x219d   :  { %v3895_v54 = vsub.f32 %v3767_v47, %v3788_v50  ;;  %8545 = vmatprep.subr.mxu1 %v3788_v50 }
0x219e   :  { %8546 = vmatpush3.msra.mxu1 %v3788_v50 }
0x219f   :  { %8548 = vmatmul.mubr.f32.vlgmr.msra.gmra.mrb[56].mxu1 %v3867_v56  ;;  %v3896_v0 = vand.u32 4294901760, %v3895_v54  ;;  %9007 = vmatprep.subr.bf16.mxu1 %v9294_v51 }
0x21a0   :  { %8550 = vmatprep.mubr.f32.mxu1 %v3877_v63 }
0x21a1   :  { %v3897_v2 = vsub.f32 %v3895_v54, %v3896_v0 }
0x21a3   :  { %8551 = vmatmul.mubr.f32.gmra.mrb[58].mxu1 %v3887_v1  ;;  %v3898_v3 = vand.u32 4294901760, %v3897_v2 }
0x21a4   :  { %8601 = vmatprep.mubr.msk.f32.mxu1 %vm9295_vm1, %v9296_v17 }
0x21a5   :  { %8553 = vmatprep.subr.mxu0 %v3898_v3 }
0x21a6   :  { %8554 = vmatpush3.msra.mxu0 %v3898_v3 }
0x21a7   :  { %8556 = vmatmul.mubr.f32.vlgmr.msra.gmra.mrb[2].mxu0 %v3863_v62  ;;  %8561 = vmatprep.subr.mxu0 %v3895_v54 }
0x21a8   :  { %8558 = vmatprep.mubr.f32.mxu0 %v3873_v61  ;;  %8562 = vmatpush3.msra.mxu0 %v3895_v54 }
0x21a9   :  { %8569 = vmatprep.subr.mxu0 %v3788_v50 }
0x21ab   :  { %8559 = vmatmul.mubr.f32.gmra.mrb[64].mxu0 %v3883_v39 }
0x21ac   :  { %8563 = vmatprep.mubr.f32.mxu0 %v3854_v33 }
0x21af   :  { %8564 = vmatmul.mubr.f32.vlgmr.msra.gmra.mrb[2].mxu0 %v3864_v38 }
0x21b0   :  { %8570 = vmatpush3.msra.mxu0 %v3788_v50  ;;  %8566 = vmatprep.mubr.f32.mxu0 %v3874_v40 }
0x21b1   :  { %8577 = vmatprep.subr.mxu0 %v3896_v0 }
0x21b3   :  { %8567 = vmatmul.mubr.f32.gmra.mrb[64].mxu0 %v3884_v42 }
0x21b4   :  { %8571 = vmatprep.mubr.f32.mxu0 %v3855_v34 }
0x21b7   :  { %8572 = vmatmul.mubr.f32.vlgmr.msra.gmra.mrb[2].mxu0 %v3865_v41 }
0x21b8   :  { %8578 = vmatpush3.msra.mxu0 %v3896_v0  ;;  %8574 = vmatprep.mubr.f32.mxu0 %v3875_v43 }
0x21b9   :  { %8585 = vmatprep.subr.mxu0 %v3788_v50 }
0x21bb   :  { %8575 = vmatmul.mubr.f32.gmra.mrb[64].mxu0 %v3885_v46 }
0x21bc   :  { %8579 = vmatprep.mubr.f32.mxu0 %v9584_v58 }
0x21bf   :  { %8580 = vmatmul.mubr.f32.vlgmr.msra.gmra.mrb[2].mxu0 %v3863_v62 }
0x21c0   :  { %8586 = vmatpush3.msra.mxu0 %v3788_v50  ;;  %8582 = vmatprep.mubr.f32.mxu0 %v3873_v61 }
0x21c3   :  { %8583 = vmatmul.mubr.f32.gmra.mrb[64].mxu0 %v3883_v39 }
0x21c4   :  { %8587 = vmatprep.mubr.f32.mxu0 %v9584_v58 }
0x21c7   :  { %8588 = vmatmul.mubr.f32.vlgmr.msra.gmra.mrb[2].mxu0 %v3863_v62 }
0x21c8   :  { %8590 = vmatprep.mubr.f32.mxu0 %v3873_v61 }
0x21cb   :  { %8591 = vmatmul.mubr.f32.gmra.mrb[64].mxu0 %v3883_v39 }
0x2272   :  { %v8549_v4 = vpop.f32.mrb[56].mxu1 }
0x2273   :  { %v3859_v5 = vpop.f32.mrb[57].mxu1 }
0x2276   :  { %v8552_v6 = vpop.f32.mrb[58].mxu1 }
0x2277   :  { %v3879_v7 = vpop.f32.mrb[59].mxu1 }
0x229a   :  { %v8589_v8 = vpop.f32.mrb[2].mxu0 }
0x229b   :  { %v9115_v9 = vadd.f32 %v8589_v8, %v8549_v4  ;;  %v4340_v10 = vpop.f32.mrb[3].mxu0 }
0x229c   :  { %v9116_v11 = vadd.f32 %v4340_v10, %v3859_v5 }
0x229d   :  { %v4363_v13 = vmul.f32 0.5, %v9115_v9 }
0x229e   :  { %v4362_v15 = vmul.f32 0.5, %v9116_v11  ;;  %v8592_v16 = vpop.f32.mrb[64].mxu0 }
0x229f   :  { %v9638_v18 = vsub.f32 %v3772_v12, %v4363_v13  ;;  %v9117_v58 = vadd.f32 %v8592_v16, %v8552_v6  ;;  %v4352_v19 = vpop.f32.mrb[65].mxu0 }
0x22a0   :  { %v9640_v20 = vsub.f32 %v3771_v14, %v4362_v15  ;;  %v9118_v21 = vadd.f32 %v4352_v19, %v3879_v7 }
0x22a1   :  { %v4365_v23 = vmul.f32 0.5, %v9117_v58  ;;  %v4409_v24 = vand.u32 4294901760, %v9638_v18  ;;  %v4898_v7 = vsel %vm25_vm0, %v9638_v18, 0 }
0x22a2   :  { %v4364_v55 = vmul.f32 0.5, %v9118_v21  ;;  %4370 = vxpose.xlu1.b32.start [1/4] (short) (narrow) %v9640_v20, 8  ;;  %v4406_v48 = vand.u32 4294901760, %v9640_v20  ;;  %v4895_v26 = vsel %vm25_vm0, %v9640_v20, 0  ;;  %v4982_v9 = vand.u32 4294901760, %v4898_v7 }
0x22a3   :  { %v9649_v27 = vsub.f32 %v3774_v22, %v4365_v23  ;;  %v4493_v28 = vsub.f32 %v9638_v18, %v4409_v24  ;;  %v9652_v29 = vand.u32 4294901760, %v4895_v26 }
0x22a4   :  { %v9654_v52 = vsub.f32 %v3773_v25, %v4364_v55  ;;  %v9656_v30 = vpack.c.bf16 %v4409_v24, %v4406_v48  ;;  %v4486_v45 = vsub.f32 %v9640_v20, %v4406_v48  ;;  %v4983_v12 = vsub.f32 %v4898_v7, %v4982_v9 }
0x22a5   :  { %v4415_v31 = vand.u32 4294901760, %v9649_v27  ;;  %v9661_v32 = vsub.f32 %v4895_v26, %v9652_v29  ;;  %v4494_v33 = vand.u32 4294901760, %v4493_v28  ;;  %v4904_v11 = vsel %vm25_vm0, %v9649_v27, 0 }
0x22a6   :  { %4371 = vxpose.xlu1.b32.cont [2/4] (short) (narrow) %v9638_v18, 8  ;;  %9009 = vmatpush3.bf16.msra.mxu1 %v9656_v30  ;;  %v4412_v34 = vand.u32 4294901760, %v9654_v52  ;;  %v4487_v35 = vand.u32 4294901760, %v4486_v45  ;;  %v9020_v36 = vpack.c.bf16 %v4493_v28, %v4486_v45  ;;  %v4901_v8 = vsel %vm25_vm0, %v9654_v52, 0 }
0x22a7   :  { %9010 = vmatprep.subr.bf16.mxu1 %v9294_v51  ;;  %v4507_v60 = vsub.f32 %v9649_v27, %v4415_v31  ;;  %v4974_v59 = vand.u32 4294901760, %v9661_v32  ;;  %v4495_v62 = vsub.f32 %v4493_v28, %v4494_v33  ;;  %v4992_v10 = vand.u32 4294901760, %v4901_v8 }
0x22a8   :  { %v9011_v61 = vpack.c.bf16 %v4415_v31, %v4412_v34  ;;  %v4500_v37 = vsub.f32 %v9654_v52, %v4412_v34  ;;  %v4488_v38 = vsub.f32 %v4486_v45, %v4487_v35  ;;  %v9032_v39 = vpack.c.bf16 %v4494_v33, %v4487_v35 }
0x22a9   :  { %v4975_v40 = vsub.f32 %v9661_v32, %v4974_v59  ;;  %v4496_v41 = vand.u32 4294901760, %v4495_v62  ;;  %v4508_v42 = vand.u32 4294901760, %v4507_v60  ;;  %v5002_v13 = vand.u32 4294901760, %v4904_v11 }
0x22aa   :  { %4372 = vxpose.xlu1.b32.cont [3/4] (short) (narrow) %v9654_v52, 8  ;;  %9012 = vmatpush3.bf16.msra.mxu1 %v9011_v61  ;;  %v4489_v43 = vand.u32 4294901760, %v4488_v38  ;;  %v4501_v44 = vand.u32 4294901760, %v4500_v37  ;;  %v9023_v46 = vpack.c.bf16 %v4507_v60, %v4500_v37  ;;  %v4993_v14 = vsub.f32 %v4901_v8, %v4992_v10 }
0x22ab   :  { %v4976_v47 = vand.u32 4294901760, %v4975_v40  ;;  %9013 = vmatprep.subr.bf16.mxu1 %v9294_v51  ;;  %v4509_v49 = vsub.f32 %v4507_v60, %v4508_v42  ;;  %v4984_v15 = vand.u32 4294901760, %v4983_v12  ;;  %v5003_v16 = vsub.f32 %v4904_v11, %v5002_v13 }
0x22ac   :  { %v9014_v50 = vpack.c.bf16 %v4496_v41, %v4489_v43  ;;  %v4502_v53 = vsub.f32 %v4500_v37, %v4501_v44  ;;  %v9035_v54 = vpack.c.bf16 %v4508_v42, %v4501_v44  ;;  %v4994_v58 = vand.u32 4294901760, %v4993_v14 }
0x22ad   :  { %8661 = vmatprep.mubr.f32.mxu0 %v4976_v47  ;;  %v4510_v56 = vand.u32 4294901760, %v4509_v49  ;;  %v4985_v19 = vsub.f32 %v4983_v12, %v4984_v15  ;;  %v5004_v21 = vand.u32 4294901760, %v5003_v16  ;;  %v4890_v60 = vmul.f32 1.5, %v9640_v20 }
0x22ae   :  { %4373 = vxpose.xlu1.b32.end [4/4] (short) (narrow) %v9649_v27, 8  ;;  %v4503_v57 = vand.u32 4294901760, %v4502_v53  ;;  %v4995_v23 = vsub.f32 %v4993_v14, %v4994_v58  ;;  %v4893_v38 = vmul.f32 1.5, %v9649_v27  ;;  %v4892_v41 = vmul.f32 1.5, %v9654_v52 }
0x22af   :  { %v4986_v48 = vand.u32 4294901760, %v4985_v19  ;;  %v5005_v26 = vsub.f32 %v5003_v16, %v5004_v21 }
0x22b0   :  { %v9017_v63 = vpack.c.bf16 %v4510_v56, %v4503_v57  ;;  %v4996_v28 = vand.u32 4294901760, %v4995_v23 }
0x22b1   :  { %v5006_v45 = vand.u32 4294901760, %v5005_v26 }
0x2322   :  { %v4386_v0 = vpop.trf.xlu1 }
0x2323   :  { %v4403_v1 = vsel %vm121_vm2, %v4386_v0, 0 }
0x2324   :  { %v4474_v2 = vand.u32 4294901760, %v4403_v1 }
0x2326   :  { %v4475_v3 = vsub.f32 %v4403_v1, %v4474_v2 }
0x2328   :  { %v4476_v4 = vand.u32 4294901760, %v4475_v3 }
0x232a   :  { %v4477_v5 = vsub.f32 %v4475_v3, %v4476_v4 }
0x232c   :  { %v4478_v6 = vand.u32 4294901760, %v4477_v5 }
0x232e   :  { %8602 = vmatmul.mubr.f32.vlgmr.msra.gmra.mrb[60].mxu1 %v4478_v6 }
0x232f   :  { %9015 = vmatpush3.bf16.msra.mxu1 %v9014_v50  ;;  %8612 = vmatprep.mubr.msk.f32.mxu1 %vm9295_vm1, %v9296_v17 }
0x2330   :  { %9016 = vmatprep.subr.bf16.mxu1 %v9294_v51 }
0x2333   :  { %9018 = vmatpush3.bf16.msra.mxu1 %v9017_v63 }
0x2334   :  { %9019 = vmatprep.subr.bf16.mxu1 %v9294_v51 }
0x2336   :  { %8613 = vmatmul.mubr.f32.vlgmr.msra.gmra.mrb[60].mxu1 %v4474_v2 }
0x2337   :  { %9021 = vmatpush3.bf16.msra.mxu1 %v9020_v36  ;;  %8623 = vmatprep.mubr.msk.f32.mxu1 %vm9295_vm1, %v9296_v17 }
0x2338   :  { %9022 = vmatprep.subr.bf16.mxu1 %v9294_v51 }
0x233b   :  { %9024 = vmatpush3.bf16.msra.mxu1 %v9023_v46 }
0x233c   :  { %9025 = vmatprep.subr.bf16.mxu1 %v9294_v51 }
0x233e   :  { %8624 = vmatmul.mubr.f32.vlgmr.msra.gmra.mrb[60].mxu1 %v4475_v3 }
0x233f   :  { %9027 = vmatpush3.bf16.msra.mxu1 %v9656_v30  ;;  %8634 = vmatprep.mubr.msk.f32.mxu1 %vm9295_vm1, %v9296_v17 }
0x2340   :  { %9028 = vmatprep.subr.bf16.mxu1 %v9294_v51 }
0x2343   :  { %9030 = vmatpush3.bf16.msra.mxu1 %v9011_v61 }
0x2344   :  { %9031 = vmatprep.subr.bf16.mxu1 %v9294_v51 }
0x2346   :  { %8635 = vmatmul.mubr.f32.vlgmr.msra.gmra.mrb[60].mxu1 %v4476_v4 }
0x2347   :  { %9033 = vmatpush3.bf16.msra.mxu1 %v9032_v39  ;;  %8645 = vmatprep.mubr.msk.f32.mxu1 %vm9295_vm1, %v9296_v17 }
0x2348   :  { %9034 = vmatprep.subr.bf16.mxu1 %v9294_v51 }
0x234b   :  { %9036 = vmatpush3.bf16.msra.mxu1 %v9035_v54 }
0x234c   :  { %9037 = vmatprep.subr.bf16.mxu1 %v9294_v51 }
0x234e   :  { %8646 = vmatmul.mubr.f32.vlgmr.msra.gmra.mrb[60].mxu1 %v4474_v2 }
0x234f   :  { %9039 = vmatpush3.bf16.msra.mxu1 %v9656_v30  ;;  %8656 = vmatprep.mubr.msk.f32.mxu1 %vm9295_vm1, %v9296_v17 }
0x2350   :  { %9040 = vmatprep.subr.bf16.mxu1 %v9294_v51 }
0x2353   :  { %9042 = vmatpush3.bf16.msra.mxu1 %v9011_v61 }
0x2354   :  { %9043 = vmatprep.subr.bf16.mxu1 %v9294_v51 }
0x2356   :  { %8657 = vmatmul.mubr.f32.vlgmr.msra.gmra.mrb[60].mxu1 %v4474_v2 }
0x2357   :  { %8715 = vmatprep.mubr.msk.f32.mxu1 %vm9295_vm1, %v9296_v17 }
0x2429   :  { %v4886_v22 = vpop.f32.mrb[60].mxu1 }
0x242a   :  { %v4907_v24 = vand.u32 4294901760, %v4886_v22  ;;  %v8658_v25 = vpop.f32.mrb[61].mxu1 }
0x242c   :  { %v5014_v55 = vsub.f32 %v4886_v22, %v4907_v24  ;;  %8659 = vmatprep.subr.mxu0 %v4907_v24 }
0x242d   :  { %8660 = vmatpush3.msra.mxu0 %v4907_v24 }
0x242e   :  { %8662 = vmatmul.mubr.f32.vlgmr.msra.gmra.mrb[66].mxu0 %v4986_v48  ;;  %v5015_v30 = vand.u32 4294901760, %v5014_v55 }
0x242f   :  { %8664 = vmatprep.mubr.f32.mxu0 %v4996_v28 }
0x2430   :  { %v5016_v31 = vsub.f32 %v5014_v55, %v5015_v30 }
0x2432   :  { %8665 = vmatmul.mubr.f32.gmra.mrb[68].mxu0 %v5006_v45  ;;  %v5017_v33 = vand.u32 4294901760, %v5016_v31 }
0x2433   :  { %8669 = vmatprep.mubr.f32.mxu0 %v9652_v29 }
0x2434   :  { %8667 = vmatprep.subr.mxu0 %v5017_v33 }
0x2435   :  { %8668 = vmatpush3.msra.mxu0 %v5017_v33 }
0x2436   :  { %8670 = vmatmul.mubr.f32.vlgmr.msra.gmra.mrb[66].mxu0 %v4982_v9  ;;  %8675 = vmatprep.subr.mxu0 %v5014_v55 }
0x2437   :  { %8672 = vmatprep.mubr.f32.mxu0 %v4992_v10  ;;  %8676 = vmatpush3.msra.mxu0 %v5014_v55 }
0x2438   :  { %8683 = vmatprep.subr.mxu0 %v4907_v24 }
0x243a   :  { %8673 = vmatmul.mubr.f32.gmra.mrb[68].mxu0 %v5002_v13 }
0x243b   :  { %8677 = vmatprep.mubr.f32.mxu0 %v9661_v32  ;;  %v4891_v32 = vmul.f32 1.5, %v9638_v18 }
0x243e   :  { %8678 = vmatmul.mubr.f32.vlgmr.msra.gmra.mrb[66].mxu0 %v4983_v12 }
0x243f   :  { %8684 = vmatpush3.msra.mxu0 %v4907_v24  ;;  %8680 = vmatprep.mubr.f32.mxu0 %v4993_v14 }
0x2440   :  { %8691 = vmatprep.subr.mxu0 %v5015_v30 }
0x2442   :  { %8681 = vmatmul.mubr.f32.gmra.mrb[68].mxu0 %v5003_v16 }
0x2443   :  { %8685 = vmatprep.mubr.f32.mxu0 %v4974_v59 }
0x2446   :  { %8686 = vmatmul.mubr.f32.vlgmr.msra.gmra.mrb[66].mxu0 %v4984_v15 }
0x2447   :  { %8692 = vmatpush3.msra.mxu0 %v5015_v30  ;;  %8688 = vmatprep.mubr.f32.mxu0 %v4994_v58 }
0x2448   :  { %8699 = vmatprep.subr.mxu0 %v4907_v24 }
0x244a   :  { %8689 = vmatmul.mubr.f32.gmra.mrb[68].mxu0 %v5004_v21 }
0x244b   :  { %8693 = vmatprep.mubr.f32.mxu0 %v9652_v29 }
0x244e   :  { %8694 = vmatmul.mubr.f32.vlgmr.msra.gmra.mrb[66].mxu0 %v4982_v9 }
0x244f   :  { %8700 = vmatpush3.msra.mxu0 %v4907_v24  ;;  %8696 = vmatprep.mubr.f32.mxu0 %v4992_v10 }
0x2452   :  { %8697 = vmatmul.mubr.f32.gmra.mrb[68].mxu0 %v5002_v13 }
0x2453   :  { %8701 = vmatprep.mubr.f32.mxu0 %v9652_v29 }
0x2456   :  { %8702 = vmatmul.mubr.f32.vlgmr.msra.gmra.mrb[66].mxu0 %v4982_v9 }
0x2457   :  { %8704 = vmatprep.mubr.f32.mxu0 %v4992_v10 }
0x245a   :  { %8705 = vmatmul.mubr.f32.gmra.mrb[68].mxu0 %v5002_v13 }
0x2529   :  { %v8703_v34 = vpop.f32.mrb[66].mxu0 }
0x252a   :  { %v5482_v35 = vmul.f32 0.5, %v8703_v34  ;;  %v5459_v36 = vpop.f32.mrb[67].mxu0 }
0x252b   :  { %v5481_v59 = vmul.f32 0.5, %v5459_v36 }
0x252c   :  { %v9715_v62 = vsub.f32 %v4891_v32, %v5482_v35 }
0x252d   :  { %v9717_v61 = vsub.f32 %v4890_v60, %v5481_v59  ;;  %v8706_v37 = vpop.f32.mrb[68].mxu0 }
0x252e   :  { %v5484_v39 = vmul.f32 0.5, %v8706_v37  ;;  %v5471_v29 = vpop.f32.mrb[69].mxu0  ;;  %v5528_v40 = vand.u32 4294901760, %v9715_v62  ;;  %v6017_v28 = vsel %vm25_vm0, %v9715_v62, 0 }
0x252f   :  { %v5483_v42 = vmul.f32 0.5, %v5471_v29  ;;  %5489 = vxpose.xlu0.b32.start [1/4] (short) (narrow) %v9717_v61, 8  ;;  %v5525_v18 = vand.u32 4294901760, %v9717_v61  ;;  %v6014_v20 = vsel %vm25_vm0, %v9717_v61, 0  ;;  %v6101_v45 = vand.u32 4294901760, %v6017_v28 }
0x2530   :  { %v9726_v43 = vsub.f32 %v4893_v38, %v5484_v39  ;;  %v5612_v44 = vsub.f32 %v9715_v62, %v5528_v40  ;;  %v9729_v46 = vand.u32 4294901760, %v6014_v20 }
0x2531   :  { %v9731_v27 = vsub.f32 %v4892_v41, %v5483_v42  ;;  %v9733_v47 = vpack.c.bf16 %v5528_v40, %v5525_v18  ;;  %v5605_v52 = vsub.f32 %v9717_v61, %v5525_v18  ;;  %v6102_v34 = vsub.f32 %v6017_v28, %v6101_v45 }
0x2532   :  { %v5534_v49 = vand.u32 4294901760, %v9726_v43  ;;  %v9738_v50 = vsub.f32 %v6014_v20, %v9729_v46  ;;  %v5613_v53 = vand.u32 4294901760, %v5612_v44  ;;  %v6023_v33 = vsel %vm25_vm0, %v9726_v43, 0 }
0x2533   :  { %5490 = vxpose.xlu0.b32.cont [2/4] (short) (narrow) %v9715_v62, 8  ;;  %9045 = vmatpush3.bf16.msra.mxu1 %v9733_v47  ;;  %v5531_v54 = vand.u32 4294901760, %v9731_v27  ;;  %v5606_v56 = vand.u32 4294901760, %v5605_v52  ;;  %v9056_v57 = vpack.c.bf16 %v5612_v44, %v5605_v52  ;;  %v6020_v30 = vsel %vm25_vm0, %v9731_v27, 0 }
0x2534   :  { %9046 = vmatprep.subr.bf16.mxu1 %v9294_v51  ;;  %v5626_v63 = vsub.f32 %v9726_v43, %v5534_v49  ;;  %v6093_v0 = vand.u32 4294901760, %v9738_v50  ;;  %v5614_v1 = vsub.f32 %v5612_v44, %v5613_v53  ;;  %v6111_v31 = vand.u32 4294901760, %v6020_v30 }
0x2535   :  { %v9047_v2 = vpack.c.bf16 %v5534_v49, %v5531_v54  ;;  %v5619_v3 = vsub.f32 %v9731_v27, %v5531_v54  ;;  %v5607_v4 = vsub.f32 %v5605_v52, %v5606_v56  ;;  %v9068_v5 = vpack.c.bf16 %v5613_v53, %v5606_v56 }
0x2536   :  { %v6094_v6 = vsub.f32 %v9738_v50, %v6093_v0  ;;  %v5615_v7 = vand.u32 4294901760, %v5614_v1  ;;  %v5627_v8 = vand.u32 4294901760, %v5626_v63  ;;  %v6121_v32 = vand.u32 4294901760, %v6023_v33 }
0x2537   :  { %5491 = vxpose.xlu0.b32.cont [3/4] (short) (narrow) %v9731_v27, 8  ;;  %9048 = vmatpush3.bf16.msra.mxu1 %v9047_v2  ;;  %v5608_v9 = vand.u32 4294901760, %v5607_v4  ;;  %v5620_v10 = vand.u32 4294901760, %v5619_v3  ;;  %v9059_v11 = vpack.c.bf16 %v5626_v63, %v5619_v3  ;;  %v6112_v35 = vsub.f32 %v6020_v30, %v6111_v31 }
0x2538   :  { %v6095_v12 = vand.u32 4294901760, %v6094_v6  ;;  %9049 = vmatprep.subr.bf16.mxu1 %v9294_v51  ;;  %v5628_v13 = vsub.f32 %v5626_v63, %v5627_v8  ;;  %v6103_v36 = vand.u32 4294901760, %v6102_v34  ;;  %v6122_v60 = vsub.f32 %v6023_v33, %v6121_v32 }
0x2539   :  { %v9050_v14 = vpack.c.bf16 %v5615_v7, %v5608_v9  ;;  %v5621_v15 = vsub.f32 %v5619_v3, %v5620_v10  ;;  %v9071_v16 = vpack.c.bf16 %v5627_v8, %v5620_v10  ;;  %v6113_v59 = vand.u32 4294901760, %v6112_v35 }
0x253a   :  { %8775 = vmatprep.mubr.f32.mxu0 %v6095_v12  ;;  %v5629_v58 = vand.u32 4294901760, %v5628_v13  ;;  %v6104_v37 = vsub.f32 %v6102_v34, %v6103_v36  ;;  %v6123_v38 = vand.u32 4294901760, %v6122_v60  ;;  %v6009_v63 = vmul.f32 1.5, %v9717_v61 }
0x253b   :  { %5492 = vxpose.xlu0.b32.end [4/4] (short) (narrow) %v9726_v43, 8  ;;  %v5622_v19 = vand.u32 4294901760, %v5621_v15  ;;  %v6114_v29 = vsub.f32 %v6112_v35, %v6113_v59  ;;  %v6012_v4 = vmul.f32 1.5, %v9726_v43  ;;  %v6011_v7 = vmul.f32 1.5, %v9731_v27 }
0x253c   :  { %v6105_v18 = vand.u32 4294901760, %v6104_v37  ;;  %v6124_v20 = vsub.f32 %v6122_v60, %v6123_v38 }
0x253d   :  { %v9053_v21 = vpack.c.bf16 %v5629_v58, %v5622_v19  ;;  %v6115_v44 = vand.u32 4294901760, %v6114_v29 }
0x253e   :  { %v6125_v52 = vand.u32 4294901760, %v6124_v20 }
0x25af   :  { %v5505_v22 = vpop.trf.xlu0 }
0x25b0   :  { %v5522_v23 = vsel %vm121_vm2, %v5505_v22, 0 }
0x25b1   :  { %v5593_v24 = vand.u32 4294901760, %v5522_v23 }
0x25b3   :  { %v5594_v25 = vsub.f32 %v5522_v23, %v5593_v24 }
0x25b5   :  { %v5595_v55 = vand.u32 4294901760, %v5594_v25 }
0x25b7   :  { %v5596_v48 = vsub.f32 %v5594_v25, %v5595_v55 }
0x25b9   :  { %v5597_v26 = vand.u32 4294901760, %v5596_v48 }
0x25bb   :  { %8716 = vmatmul.mubr.f32.vlgmr.msra.gmra.mrb[62].mxu1 %v5597_v26 }
0x25bc   :  { %9051 = vmatpush3.bf16.msra.mxu1 %v9050_v14  ;;  %8726 = vmatprep.mubr.msk.f32.mxu1 %vm9295_vm1, %v9296_v17 }
0x25bd   :  { %9052 = vmatprep.subr.bf16.mxu1 %v9294_v51 }
0x25c0   :  { %9054 = vmatpush3.bf16.msra.mxu1 %v9053_v21 }
0x25c1   :  { %9055 = vmatprep.subr.bf16.mxu1 %v9294_v51 }
0x25c3   :  { %8727 = vmatmul.mubr.f32.vlgmr.msra.gmra.mrb[62].mxu1 %v5593_v24 }
0x25c4   :  { %9057 = vmatpush3.bf16.msra.mxu1 %v9056_v57  ;;  %8737 = vmatprep.mubr.msk.f32.mxu1 %vm9295_vm1, %v9296_v17 }
0x25c5   :  { %9058 = vmatprep.subr.bf16.mxu1 %v9294_v51 }
0x25c8   :  { %9060 = vmatpush3.bf16.msra.mxu1 %v9059_v11 }
0x25c9   :  { %9061 = vmatprep.subr.bf16.mxu1 %v9294_v51 }
0x25cb   :  { %8738 = vmatmul.mubr.f32.vlgmr.msra.gmra.mrb[62].mxu1 %v5594_v25 }
0x25cc   :  { %9063 = vmatpush3.bf16.msra.mxu1 %v9733_v47  ;;  %8748 = vmatprep.mubr.msk.f32.mxu1 %vm9295_vm1, %v9296_v17 }
0x25cd   :  { %9064 = vmatprep.subr.bf16.mxu1 %v9294_v51 }
0x25d0   :  { %9066 = vmatpush3.bf16.msra.mxu1 %v9047_v2 }
0x25d1   :  { %9067 = vmatprep.subr.bf16.mxu1 %v9294_v51 }
0x25d3   :  { %8749 = vmatmul.mubr.f32.vlgmr.msra.gmra.mrb[62].mxu1 %v5595_v55 }
0x25d4   :  { %9069 = vmatpush3.bf16.msra.mxu1 %v9068_v5  ;;  %8759 = vmatprep.mubr.msk.f32.mxu1 %vm9295_vm1, %v9296_v17 }
0x25d5   :  { %9070 = vmatprep.subr.bf16.mxu1 %v9294_v51 }
0x25d8   :  { %9072 = vmatpush3.bf16.msra.mxu1 %v9071_v16 }
0x25d9   :  { %9073 = vmatprep.subr.bf16.mxu1 %v9294_v51 }
0x25db   :  { %8760 = vmatmul.mubr.f32.vlgmr.msra.gmra.mrb[62].mxu1 %v5593_v24 }
0x25dc   :  { %9075 = vmatpush3.bf16.msra.mxu1 %v9733_v47  ;;  %8770 = vmatprep.mubr.msk.f32.mxu1 %vm9295_vm1, %v9296_v17 }
0x25dd   :  { %9076 = vmatprep.subr.bf16.mxu1 %v9294_v51 }
0x25e0   :  { %9078 = vmatpush3.bf16.msra.mxu1 %v9047_v2 }
0x25e1   :  { %9079 = vmatprep.subr.bf16.mxu1 %v9294_v51 }
0x25e3   :  { %8771 = vmatmul.mubr.f32.vlgmr.msra.gmra.mrb[62].mxu1 %v5593_v24 }
0x25e4   :  { %8829 = vmatprep.mubr.msk.f32.mxu1 %vm9295_vm1, %v9296_v17 }
0x26b6   :  { %v6005_v39 = vpop.f32.mrb[62].mxu1 }
0x26b7   :  { %v6026_v40 = vand.u32 4294901760, %v6005_v39  ;;  %v8772_v41 = vpop.f32.mrb[63].mxu1 }
0x26b9   :  { %v6133_v42 = vsub.f32 %v6005_v39, %v6026_v40  ;;  %8773 = vmatprep.subr.mxu0 %v6026_v40 }
0x26ba   :  { %8774 = vmatpush3.msra.mxu0 %v6026_v40 }
0x26bb   :  { %8776 = vmatmul.mubr.f32.vlgmr.msra.gmra.mrb[70].mxu0 %v6105_v18  ;;  %v6134_v47 = vand.u32 4294901760, %v6133_v42 }
0x26bc   :  { %8778 = vmatprep.mubr.f32.mxu0 %v6115_v44 }
0x26bd   :  { %v6135_v49 = vsub.f32 %v6133_v42, %v6134_v47 }
0x26bf   :  { %8779 = vmatmul.mubr.f32.gmra.mrb[72].mxu0 %v6125_v52  ;;  %v6136_v53 = vand.u32 4294901760, %v6135_v49 }
0x26c0   :  { %8783 = vmatprep.mubr.f32.mxu0 %v9729_v46 }
0x26c1   :  { %8781 = vmatprep.subr.mxu0 %v6136_v53 }
0x26c2   :  { %8782 = vmatpush3.msra.mxu0 %v6136_v53 }
0x26c3   :  { %8784 = vmatmul.mubr.f32.vlgmr.msra.gmra.mrb[70].mxu0 %v6101_v45  ;;  %8789 = vmatprep.subr.mxu0 %v6133_v42 }
0x26c4   :  { %8786 = vmatprep.mubr.f32.mxu0 %v6111_v31  ;;  %8790 = vmatpush3.msra.mxu0 %v6133_v42 }
0x26c5   :  { %8797 = vmatprep.subr.mxu0 %v6026_v40 }
0x26c7   :  { %8787 = vmatmul.mubr.f32.gmra.mrb[72].mxu0 %v6121_v32 }
0x26c8   :  { %8791 = vmatprep.mubr.f32.mxu0 %v9738_v50  ;;  %v6010_v50 = vmul.f32 1.5, %v9715_v62 }
0x26cb   :  { %8792 = vmatmul.mubr.f32.vlgmr.msra.gmra.mrb[70].mxu0 %v6102_v34 }
0x26cc   :  { %8798 = vmatpush3.msra.mxu0 %v6026_v40  ;;  %8794 = vmatprep.mubr.f32.mxu0 %v6112_v35 }
0x26cd   :  { %8805 = vmatprep.subr.mxu0 %v6134_v47 }
0x26cf   :  { %8795 = vmatmul.mubr.f32.gmra.mrb[72].mxu0 %v6122_v60 }
0x26d0   :  { %8799 = vmatprep.mubr.f32.mxu0 %v6093_v0 }
0x26d3   :  { %8800 = vmatmul.mubr.f32.vlgmr.msra.gmra.mrb[70].mxu0 %v6103_v36 }
0x26d4   :  { %8806 = vmatpush3.msra.mxu0 %v6134_v47  ;;  %8802 = vmatprep.mubr.f32.mxu0 %v6113_v59 }
0x26d5   :  { %8813 = vmatprep.subr.mxu0 %v6026_v40 }
0x26d7   :  { %8803 = vmatmul.mubr.f32.gmra.mrb[72].mxu0 %v6123_v38 }
0x26d8   :  { %8807 = vmatprep.mubr.f32.mxu0 %v9729_v46 }
0x26db   :  { %8808 = vmatmul.mubr.f32.vlgmr.msra.gmra.mrb[70].mxu0 %v6101_v45 }
0x26dc   :  { %8814 = vmatpush3.msra.mxu0 %v6026_v40  ;;  %8810 = vmatprep.mubr.f32.mxu0 %v6111_v31 }
0x26df   :  { %8811 = vmatmul.mubr.f32.gmra.mrb[72].mxu0 %v6121_v32 }
0x26e0   :  { %8815 = vmatprep.mubr.f32.mxu0 %v9729_v46 }
0x26e3   :  { %8816 = vmatmul.mubr.f32.vlgmr.msra.gmra.mrb[70].mxu0 %v6101_v45 }
0x26e4   :  { %8818 = vmatprep.mubr.f32.mxu0 %v6111_v31 }
0x26e7   :  { %8819 = vmatmul.mubr.f32.gmra.mrb[72].mxu0 %v6121_v32 }
0x27b6   :  { %v8817_v54 = vpop.f32.mrb[70].mxu0 }
0x27b7   :  { %v6601_v56 = vmul.f32 0.5, %v8817_v54  ;;  %v6578_v57 = vpop.f32.mrb[71].mxu0 }
0x27b8   :  { %v6600_v0 = vmul.f32 0.5, %v6578_v57 }
0x27b9   :  { %v9792_v1 = vsub.f32 %v6010_v50, %v6601_v56 }
0x27ba   :  { %v9794_v2 = vsub.f32 %v6009_v63, %v6600_v0  ;;  %v8820_v3 = vpop.f32.mrb[72].mxu0 }
0x27bb   :  { %v6603_v5 = vmul.f32 0.5, %v8820_v3  ;;  %v6590_v46 = vpop.f32.mrb[73].mxu0  ;;  %v6647_v6 = vand.u32 4294901760, %v9792_v1  ;;  %v7136_v44 = vsel %vm25_vm0, %v9792_v1, 0 }
0x27bc   :  { %v6602_v8 = vmul.f32 0.5, %v6590_v46  ;;  %6608 = vxpose.xlu1.b32.start [1/4] (short) (narrow) %v9794_v2, 8  ;;  %v6644_v62 = vand.u32 4294901760, %v9794_v2  ;;  %v7133_v61 = vsel %vm25_vm0, %v9794_v2, 0  ;;  %v7220_v52 = vand.u32 4294901760, %v7136_v44 }
0x27bd   :  { %v9803_v9 = vsub.f32 %v6012_v4, %v6603_v5  ;;  %v6731_v10 = vsub.f32 %v9792_v1, %v6647_v6  ;;  %v9806_v11 = vand.u32 4294901760, %v7133_v61 }
0x27be   :  { %v9808_v43 = vsub.f32 %v6011_v7, %v6602_v8  ;;  %v9810_v12 = vpack.c.bf16 %v6647_v6, %v6644_v62  ;;  %v6724_v27 = vsub.f32 %v9794_v2, %v6644_v62  ;;  %v7221_v54 = vsub.f32 %v7136_v44, %v7220_v52 }
0x27bf   :  { %v6653_v13 = vand.u32 4294901760, %v9803_v9  ;;  %v9815_v14 = vsub.f32 %v7133_v61, %v9806_v11  ;;  %v6732_v15 = vand.u32 4294901760, %v6731_v10  ;;  %v7142_v53 = vsel %vm25_vm0, %v9803_v9, 0 }
0x27c0   :  { %6609 = vxpose.xlu1.b32.cont [2/4] (short) (narrow) %v9792_v1, 8  ;;  %9081 = vmatpush3.bf16.msra.mxu1 %v9810_v12  ;;  %v6650_v16 = vand.u32 4294901760, %v9808_v43  ;;  %v6725_v58 = vand.u32 4294901760, %v6724_v27  ;;  %v9092_v19 = vpack.c.bf16 %v6731_v10, %v6724_v27  ;;  %v7139_v47 = vsel %vm25_vm0, %v9808_v43, 0 }
0x27c1   :  { %9082 = vmatprep.subr.bf16.mxu1 %v9294_v51  ;;  %v6745_v21 = vsub.f32 %v9803_v9, %v6653_v13  ;;  %v7212_v22 = vand.u32 4294901760, %v9815_v14  ;;  %v6733_v23 = vsub.f32 %v6731_v10, %v6732_v15  ;;  %v7230_v49 = vand.u32 4294901760, %v7139_v47 }
0x27c2   :  { %v9083_v24 = vpack.c.bf16 %v6653_v13, %v6650_v16  ;;  %v6738_v25 = vsub.f32 %v9808_v43, %v6650_v16  ;;  %v6726_v55 = vsub.f32 %v6724_v27, %v6725_v58  ;;  %v9104_v48 = vpack.c.bf16 %v6732_v15, %v6725_v58 }
0x27c3   :  { %v7213_v26 = vsub.f32 %v9815_v14, %v7212_v22  ;;  %v6734_v28 = vand.u32 4294901760, %v6733_v23  ;;  %v6746_v30 = vand.u32 4294901760, %v6745_v21  ;;  %v7240_v50 = vand.u32 4294901760, %v7142_v53 }
0x27c4   :  { %6610 = vxpose.xlu1.b32.cont [3/4] (short) (narrow) %v9808_v43, 8  ;;  %9084 = vmatpush3.bf16.msra.mxu1 %v9083_v24  ;;  %v6727_v45 = vand.u32 4294901760, %v6726_v55  ;;  %v6739_v31 = vand.u32 4294901760, %v6738_v25  ;;  %v9095_v33 = vpack.c.bf16 %v6745_v21, %v6738_v25  ;;  %v7231_v56 = vsub.f32 %v7139_v47, %v7230_v49 }
0x27c5   :  { %v7214_v34 = vand.u32 4294901760, %v7213_v26  ;;  %9085 = vmatprep.subr.bf16.mxu1 %v9294_v51  ;;  %v6747_v32 = vsub.f32 %v6745_v21, %v6746_v30  ;;  %v7222_v57 = vand.u32 4294901760, %v7221_v54  ;;  %v7128_v58 = vmul.f32 1.5, %v9794_v2 }
0x27c6   :  { %v9086_v35 = vpack.c.bf16 %v6734_v28, %v6727_v45  ;;  %v6740_v36 = vsub.f32 %v6738_v25, %v6739_v31  ;;  %v9107_v60 = vpack.c.bf16 %v6746_v30, %v6739_v31  ;;  %v7232_v63 = vand.u32 4294901760, %v7231_v56 }
0x27c7   :  { %8889 = vmatprep.mubr.f32.mxu0 %v7214_v34  ;;  %v6748_v59 = vand.u32 4294901760, %v6747_v32 }
0x27c8   :  { %6611 = vxpose.xlu1.b32.end [4/4] (short) (narrow) %v9803_v9, 8  ;;  %v6741_v37 = vand.u32 4294901760, %v6740_v36  ;;  %v7233_v4 = vsub.f32 %v7231_v56, %v7232_v63 }
0x27ca   :  { %v9089_v38 = vpack.c.bf16 %v6748_v59, %v6741_v37  ;;  %v7234_v62 = vand.u32 4294901760, %v7233_v4 }
0x283c   :  { %v6624_v39 = vpop.trf.xlu1 }
0x283d   :  { %v6641_v29 = vsel %vm121_vm2, %v6624_v39, 0 }
0x283e   :  { %v6712_v40 = vand.u32 4294901760, %v6641_v29 }
0x2840   :  { %v6713_v41 = vsub.f32 %v6641_v29, %v6712_v40 }
0x2842   :  { %v6714_v42 = vand.u32 4294901760, %v6713_v41 }
0x2844   :  { %v6715_v18 = vsub.f32 %v6713_v41, %v6714_v42 }
0x2846   :  { %v6716_v20 = vand.u32 4294901760, %v6715_v18 }
0x2848   :  { %8830 = vmatmul.mubr.f32.vlgmr.msra.gmra.mrb[64].mxu1 %v6716_v20 }
0x2849   :  { %9087 = vmatpush3.bf16.msra.mxu1 %v9086_v35  ;;  %8840 = vmatprep.mubr.msk.f32.mxu1 %vm9295_vm1, %v9296_v17 }
0x284a   :  { %9088 = vmatprep.subr.bf16.mxu1 %v9294_v51 }
0x284d   :  { %9090 = vmatpush3.bf16.msra.mxu1 %v9089_v38 }
0x284e   :  { %9091 = vmatprep.subr.bf16.mxu1 %v9294_v51 }
0x2850   :  { %8841 = vmatmul.mubr.f32.vlgmr.msra.gmra.mrb[64].mxu1 %v6712_v40 }
0x2851   :  { %9093 = vmatpush3.bf16.msra.mxu1 %v9092_v19  ;;  %8851 = vmatprep.mubr.msk.f32.mxu1 %vm9295_vm1, %v9296_v17 }
0x2852   :  { %9094 = vmatprep.subr.bf16.mxu1 %v9294_v51 }
0x2855   :  { %9096 = vmatpush3.bf16.msra.mxu1 %v9095_v33 }
0x2856   :  { %9097 = vmatprep.subr.bf16.mxu1 %v9294_v51 }
0x2858   :  { %8852 = vmatmul.mubr.f32.vlgmr.msra.gmra.mrb[64].mxu1 %v6713_v41 }
0x2859   :  { %9099 = vmatpush3.bf16.msra.mxu1 %v9810_v12  ;;  %8862 = vmatprep.mubr.msk.f32.mxu1 %vm9295_vm1, %v9296_v17 }
0x285a   :  { %9100 = vmatprep.subr.bf16.mxu1 %v9294_v51 }
0x285d   :  { %9102 = vmatpush3.bf16.msra.mxu1 %v9083_v24 }
0x285e   :  { %9103 = vmatprep.subr.bf16.mxu1 %v9294_v51 }
0x2860   :  { %8863 = vmatmul.mubr.f32.vlgmr.msra.gmra.mrb[64].mxu1 %v6714_v42 }
0x2861   :  { %9105 = vmatpush3.bf16.msra.mxu1 %v9104_v48  ;;  %8873 = vmatprep.mubr.msk.f32.mxu1 %vm9295_vm1, %v9296_v17 }
0x2862   :  { %9106 = vmatprep.subr.bf16.mxu1 %v9294_v51 }
0x2865   :  { %9108 = vmatpush3.bf16.msra.mxu1 %v9107_v60 }
0x2866   :  { %9109 = vmatprep.subr.bf16.mxu1 %v9294_v51 }
0x2868   :  { %8874 = vmatmul.mubr.f32.vlgmr.msra.gmra.mrb[64].mxu1 %v6712_v40 }
0x2869   :  { %9111 = vmatpush3.bf16.msra.mxu1 %v9810_v12  ;;  %8884 = vmatprep.mubr.msk.f32.mxu1 %vm9295_vm1, %v9296_v17  ;;  %v7241_v17 = vsub.f32 %v7142_v53, %v7240_v50 }
0x286a   :  { %9112 = vmatprep.subr.bf16.mxu1 %v9294_v51  ;;  %v7223_v51 = vsub.f32 %v7221_v54, %v7222_v57 }
0x286b   :  { %v7242_v0 = vand.u32 4294901760, %v7241_v17 }
0x286c   :  { %v7224_v7 = vand.u32 4294901760, %v7223_v51 }
0x286d   :  { %9114 = vmatpush3.bf16.msra.mxu1 %v9083_v24  ;;  %v7243_v8 = vsub.f32 %v7241_v17, %v7242_v0 }
0x286f   :  { %v7244_v10 = vand.u32 4294901760, %v7243_v8 }
0x2870   :  { %8885 = vmatmul.mubr.f32.vlgmr.msra.gmra.mrb[64].mxu1 %v6712_v40 }
0x2943   :  { %v7124_v3 = vpop.f32.mrb[64].mxu1 }
0x2944   :  { %v7145_v5 = vand.u32 4294901760, %v7124_v3  ;;  %v8886_v46 = vpop.f32.mrb[65].mxu1 }
0x2946   :  { %v7252_v6 = vsub.f32 %v7124_v3, %v7145_v5  ;;  %8887 = vmatprep.subr.mxu0 %v7145_v5 }
0x2947   :  { %8888 = vmatpush3.msra.mxu0 %v7145_v5 }
0x2948   :  { %8890 = vmatmul.mubr.f32.vlgmr.msra.gmra.mrb[74].mxu0 %v7224_v7  ;;  %v7253_v61 = vand.u32 4294901760, %v7252_v6 }
0x2949   :  { %8892 = vmatprep.mubr.f32.mxu0 %v7234_v62 }
0x294a   :  { %v7254_v12 = vsub.f32 %v7252_v6, %v7253_v61 }
0x294c   :  { %8893 = vmatmul.mubr.f32.gmra.mrb[76].mxu0 %v7244_v10  ;;  %v7255_v27 = vand.u32 4294901760, %v7254_v12 }
0x294d   :  { %8897 = vmatprep.mubr.f32.mxu0 %v9806_v11 }
0x294e   :  { %8895 = vmatprep.subr.mxu0 %v7255_v27 }
0x294f   :  { %8896 = vmatpush3.msra.mxu0 %v7255_v27 }
0x2950   :  { %8898 = vmatmul.mubr.f32.vlgmr.msra.gmra.mrb[74].mxu0 %v7220_v52  ;;  %8903 = vmatprep.subr.mxu0 %v7252_v6 }
0x2951   :  { %8900 = vmatprep.mubr.f32.mxu0 %v7230_v49  ;;  %8904 = vmatpush3.msra.mxu0 %v7252_v6 }
0x2952   :  { %8911 = vmatprep.subr.mxu0 %v7145_v5 }
0x2954   :  { %8901 = vmatmul.mubr.f32.gmra.mrb[76].mxu0 %v7240_v50 }
0x2955   :  { %8905 = vmatprep.mubr.f32.mxu0 %v9815_v14  ;;  %v7129_v14 = vmul.f32 1.5, %v9792_v1  ;;  %v7130_v1 = vmul.f32 1.5, %v9808_v43 }
0x2958   :  { %8906 = vmatmul.mubr.f32.vlgmr.msra.gmra.mrb[74].mxu0 %v7221_v54 }
0x2959   :  { %8912 = vmatpush3.msra.mxu0 %v7145_v5  ;;  %8908 = vmatprep.mubr.f32.mxu0 %v7231_v56 }
0x295a   :  { %8919 = vmatprep.subr.mxu0 %v7253_v61 }
0x295c   :  { %8909 = vmatmul.mubr.f32.gmra.mrb[76].mxu0 %v7241_v17 }
0x295d   :  { %8913 = vmatprep.mubr.f32.mxu0 %v7212_v22 }
0x2960   :  { %8914 = vmatmul.mubr.f32.vlgmr.msra.gmra.mrb[74].mxu0 %v7222_v57 }
0x2961   :  { %8920 = vmatpush3.msra.mxu0 %v7253_v61  ;;  %8916 = vmatprep.mubr.f32.mxu0 %v7232_v63 }
0x2962   :  { %8927 = vmatprep.subr.mxu0 %v7145_v5 }
0x2964   :  { %8917 = vmatmul.mubr.f32.gmra.mrb[76].mxu0 %v7242_v0 }
0x2965   :  { %8921 = vmatprep.mubr.f32.mxu0 %v9806_v11 }
0x2968   :  { %8922 = vmatmul.mubr.f32.vlgmr.msra.gmra.mrb[74].mxu0 %v7220_v52 }
0x2969   :  { %8928 = vmatpush3.msra.mxu0 %v7145_v5  ;;  %8924 = vmatprep.mubr.f32.mxu0 %v7230_v49 }
0x296c   :  { %8925 = vmatmul.mubr.f32.gmra.mrb[76].mxu0 %v7240_v50 }
0x296d   :  { %8929 = vmatprep.mubr.f32.mxu0 %v9806_v11  ;;  %v7131_v11 = vmul.f32 1.5, %v9803_v9 }
0x2970   :  { %8930 = vmatmul.mubr.f32.vlgmr.msra.gmra.mrb[74].mxu0 %v7220_v52 }
0x2971   :  { %8932 = vmatprep.mubr.f32.mxu0 %v7230_v49 }
0x2974   :  { %8933 = vmatmul.mubr.f32.gmra.mrb[76].mxu0 %v7240_v50 }
0x2a43   :  { %v8931_v13 = vpop.f32.mrb[74].mxu0 }
0x2a44   :  { %v7720_v15 = vmul.f32 0.5, %v8931_v13  ;;  %v7697_v16 = vpop.f32.mrb[75].mxu0 }
0x2a45   :  { %v7719_v19 = vmul.f32 0.5, %v7697_v16 }
0x2a46   :  { %v7724_v21 = vsub.f32 %v7129_v14, %v7720_v15 }
0x2a47   :  { %v7723_v22 = vsub.f32 %v7128_v58, %v7719_v19  ;;  %v8934_v23 = vpop.f32.mrb[76].mxu0 }
0x2a48   :  { %7728 = vst.msk [vmem:[%s9887_s3 + $0x8] sm:$0xff] %vm25_vm0, %v7724_v21  ;;  %v7722_v24 = vmul.f32 0.5, %v8934_v23  ;;  %v7709_v25 = vpop.f32.mrb[77].mxu0 }
0x2a49   :  { %7727 = vst.msk [vmem:[%s9887_s3] sm:$0xff] %vm25_vm0, %v7723_v22  ;;  %v7721_v2 = vmul.f32 0.5, %v7709_v25 }
0x2a4a   :  { %v7726_v55 = vsub.f32 %v7131_v11, %v7722_v24 }
0x2a4b   :  { %v7725_v48 = vsub.f32 %v7130_v1, %v7721_v2 }
0x2a4c   :  { %7730 = vst.msk [vmem:[%s9887_s3 + $0x18] sm:$0xff] %vm25_vm0, %v7726_v55 }
0x2a4d   :  { %7729 = vst.msk [vmem:[%s9887_s3 + $0x10] sm:$0xff] %vm25_vm0, %v7725_v48 }

</bundles_post_ra>
